<compile_context>
chip_gen: v5e
topology: v5e:2x2
jax: 0.10.0
libtpu: 0.0.40
codegen_flags: <defaults>
</compile_context>

<pallas_src>
import functools

import jax
import jax.numpy as jnp
import numpy as np
from jax import lax
from jax.experimental import pallas as pl
from jax.experimental.pallas import tpu as pltpu


def bilstm_attention_kernel(x_ref, wih_ref, whh_ref, b_ref, attn_w_ref, attn_b_ref,
                            sum_ref, lstm_ref,
                            xp_ref, hsf_ref, hsb_ref,
                            *, T, B, D, H):
    H4 = 4 * H

    # ---- hoisted input projection: one MXU matmul for both directions, bias folded ----
    x2d = x_ref[...].reshape(T * B, D)                                    # (T*B, D)
    xp = jnp.dot(x2d, wih_ref[...], preferred_element_type=jnp.float32) + b_ref[...]
    xp_ref[...] = xp.reshape(T, B, 2 * H4)                                # (T, B, 8H)

    whh = whh_ref[...]                                                    # (H, 8H)

    # Rows 0..B-1 of the stacked state = forward direction, rows B..2B-1 = backward.
    # Mask broadcast is hoisted out of the loop (JAX does not CSE broadcast_in_dim).
    fwd_mask = lax.broadcasted_iota(jnp.int32, (2 * B, H4), 0) < B

    h0 = jnp.zeros((2 * B, H), jnp.float32)
    c0 = jnp.zeros((2 * B, H), jnp.float32)

    def step(t, carry):
        h, c = carry                                                      # (2B, H) each
        xpt = xp_ref[t]                                                   # (B, 8H)
        xpb = xp_ref[T - 1 - t]                                           # (B, 8H)
        # forward rows use x_t, backward rows use x_{T-1-t}; bias already folded in.
        xin = jnp.concatenate([xpt[:, :H4], xpb[:, H4:]], axis=0)         # (2B, 4H)

        # single recurrent matmul for both directions
        g_all = jnp.dot(h, whh, preferred_element_type=jnp.float32)       # (2B, 8H)
        gates = xin + jnp.where(fwd_mask, g_all[:, :H4], g_all[:, H4:])   # (2B, 4H)

        # gate layout (reordered in the wrapper): [i, f, o, g]
        sg = jax.nn.sigmoid(gates[:, :3 * H])
        gg = jnp.tanh(gates[:, 3 * H:])
        i_g = sg[:, :H]
        f_g = sg[:, H:2 * H]
        o_g = sg[:, 2 * H:]

        c_new = f_g * c + i_g * gg
        h_new = o_g * jnp.tanh(c_new)

        hsf_ref[t] = h_new[:B, :]          # forward hidden belongs at output time t
        hsb_ref[T - 1 - t] = h_new[B:, :]  # backward hidden belongs at output time T-1-t
        return h_new, c_new

    lax.fori_loop(0, T, step, (h0, c0), unroll=True)

    # ---- single lane-dense (2H = 128 lanes) write of the LSTM output ----
    lstm = jnp.concatenate([hsf_ref[...], hsb_ref[...]], axis=-1)         # (T, B, 2H)
    lstm_ref[...] = lstm

    # ---- attention: softmax over the time axis (axis 0 here), then weighted sum ----
    aw = attn_w_ref[...]                                                  # (1, 2H)
    scores = (jnp.sum(lstm * aw[None, :, :], axis=-1, keepdims=True)
              + attn_b_ref[...])                                          # (T, B, 1)
    m = jnp.max(scores, axis=0, keepdims=True)
    e = jnp.exp(scores - m)
    w = e / jnp.sum(e, axis=0, keepdims=True)                             # softmax over time
    sum_ref[...] = jnp.sum(lstm * w, axis=0)                              # (B, 2H)


def _reorder_gates(w):
    # PyTorch gate order [i, f, g, o] -> [i, f, o, g] along axis 0 (size 4H).
    i, f, g, o = jnp.split(w, 4, axis=0)
    return jnp.concatenate([i, f, o, g], axis=0)


def _prep_dir(wih, whh, bih, bhh):
    # PyTorch shapes: wih (4H, D), whh (4H, H), biases (4H,).
    wih_r = _reorder_gates(wih).T                     # (D, 4H)
    whh_r = _reorder_gates(whh).T                     # (H, 4H)
    b_r = _reorder_gates(bih + bhh)[None, :]          # (1, 4H)
    return wih_r, whh_r, b_r


def bilstm_attention_forward(x, params):
    """x: (B, T, D) float32.  Returns (weighted_sum (B, 2H), lstm_out (B, T, 2H))."""
    B, T, D = x.shape
    H = params["whh_f"].shape[1]

    x_tbd = jnp.transpose(x, (1, 0, 2)).astype(jnp.float32)       # (T, B, D) time-major

    wih_f, whh_f, b_f = _prep_dir(params["wih_f"], params["whh_f"],
                                  params["bih_f"], params["bhh_f"])
    wih_b, whh_b, b_b = _prep_dir(params["wih_b"], params["whh_b"],
                                  params["bih_b"], params["bhh_b"])
    w_ih_cat = jnp.concatenate([wih_f, wih_b], axis=1)            # (D, 8H)
    w_hh_cat = jnp.concatenate([whh_f, whh_b], axis=1)            # (H, 8H)
    b_cat = jnp.concatenate([b_f, b_b], axis=1)                   # (1, 8H)

    kernel = functools.partial(bilstm_attention_kernel, T=T, B=B, D=D, H=H)
    vmem = pl.BlockSpec(memory_space=pltpu.MemorySpace.VMEM)

    out_sum, lstm_tbd = pl.pallas_call(
        kernel,
        out_shape=(jax.ShapeDtypeStruct((B, 2 * H), jnp.float32),
                   jax.ShapeDtypeStruct((T, B, 2 * H), jnp.float32)),
        in_specs=[vmem] * 6,
        out_specs=(vmem, vmem),
        scratch_shapes=[pltpu.VMEM((T, B, 8 * H), jnp.float32),   # hoisted input proj
                        pltpu.VMEM((T, B, H), jnp.float32),       # forward hiddens
                        pltpu.VMEM((T, B, H), jnp.float32)],      # backward hiddens
        compiler_params=pltpu.CompilerParams(
            vmem_limit_bytes=32 * 1024 * 1024),                   # safe on v5e/v6e/v7x
    )(
        x_tbd, w_ih_cat, w_hh_cat, b_cat,
        params["attn_w"].astype(jnp.float32),                     # (1, 2H)
        params["attn_b"].reshape(1, 1).astype(jnp.float32),       # (1, 1)
    )

    lstm_out = jnp.transpose(lstm_tbd, (1, 0, 2))                 # back to (B, T, 2H)
    return out_sum, lstm_out


# ----------------------------- pure-JAX reference -----------------------------
def _ref_lstm_dir(x, wih, whh, bih, bhh, reverse):
    # PyTorch layouts: wih (4H, D), whh (4H, H), biases (4H,), gate order [i, f, g, o].
    B, T, D = x.shape
    H = whh.shape[1]

    def step(carry, x_t):
        h, c = carry
        g = x_t @ wih.T + h @ whh.T + bih + bhh
        i, f, gg, o = jnp.split(g, 4, axis=-1)
        i = jax.nn.sigmoid(i)
        f = jax.nn.sigmoid(f)
        gg = jnp.tanh(gg)
        o = jax.nn.sigmoid(o)
        c = f * c + i * gg
        h = o * jnp.tanh(c)
        return (h, c), h

    xs = jnp.transpose(x, (1, 0, 2))
    if reverse:
        xs = xs[::-1]
    (_, _), hs = lax.scan(step, (jnp.zeros((B, H)), jnp.zeros((B, H))), xs)
    if reverse:
        hs = hs[::-1]
    return jnp.transpose(hs, (1, 0, 2))


def ref_forward(x, p):
    out_f = _ref_lstm_dir(x, p["wih_f"], p["whh_f"], p["bih_f"], p["bhh_f"], False)
    out_b = _ref_lstm_dir(x, p["wih_b"], p["whh_b"], p["bih_b"], p["bhh_b"], True)
    lstm_out = jnp.concatenate([out_f, out_b], axis=-1)           # (B, T, 2H)
    scores = lstm_out @ p["attn_w"].T + p["attn_b"]               # (B, T, 1)
    w = jax.nn.softmax(scores, axis=1)
    return jnp.sum(lstm_out * w, axis=1), lstm_out


# ----------------------------------- main -------------------------------------
if __name__ == "__main__":
    # Small shapes consistent with the module (module uses D=100, H=128 at training
    # time).  2H = 128 lanes and 2B = 8 sublanes are exact vreg fits.
    B, T, D, H = 4, 8, 32, 64

    key = jax.random.PRNGKey(0)
    keys = jax.random.split(key, 11)
    bound = 1.0 / float(np.sqrt(H))

    def u(k, shape):
        return jax.random.uniform(k, shape, jnp.float32, -bound, bound)

    # PyTorch nn.LSTM parameter shapes: weight_ih (4H, D), weight_hh (4H, H),
    # biases (4H,); attention nn.Linear(2H, 1): weight (1, 2H), bias (1,).
    params = dict(
        wih_f=u(keys[0], (4 * H, D)), whh_f=u(keys[1], (4 * H, H)),
        bih_f=u(keys[2], (4 * H,)),   bhh_f=u(keys[3], (4 * H,)),
        wih_b=u(keys[4], (4 * H, D)), whh_b=u(keys[5], (4 * H, H)),
        bih_b=u(keys[6], (4 * H,)),   bhh_b=u(keys[7], (4 * H,)),
        attn_w=u(keys[8], (1, 2 * H)),
        attn_b=u(keys[9], (1,)),
    )

    x = jax.random.normal(keys[10], (B, T, D), jnp.float32)

    out_sum, lstm_out = bilstm_attention_forward(x, params)
    jax.block_until_ready((out_sum, lstm_out))

    # sanity check against a pure-JAX reference of the PyTorch semantics
    ref_sum, ref_lstm = ref_forward(x, params)

    assert out_sum.shape == (B, 2 * H) and lstm_out.shape == (B, T, 2 * H)
    np.testing.assert_allclose(np.asarray(lstm_out), np.asarray(ref_lstm),
                               rtol=1e-4, atol=1e-4)
    np.testing.assert_allclose(np.asarray(out_sum), np.asarray(ref_sum),
                               rtol=1e-4, atol=1e-4)

    print("KERNEL_OK")
</pallas_src>

<mosaic_0001>
module attributes {stable_mosaic.version = 11 : i64} {
  func.func @bilstm_attention_kernel(%arg0: memref<8x4x32xf32, #tpu.memory_space<vmem>>, %arg1: memref<32x512xf32, #tpu.memory_space<vmem>>, %arg2: memref<64x512xf32, #tpu.memory_space<vmem>>, %arg3: memref<1x512xf32, #tpu.memory_space<vmem>>, %arg4: memref<1x128xf32, #tpu.memory_space<vmem>>, %arg5: memref<1x1xf32, #tpu.memory_space<vmem>>, %arg6: memref<4x128xf32, #tpu.memory_space<vmem>>, %arg7: memref<8x4x128xf32, #tpu.memory_space<vmem>>, %arg8: memref<8x4x512xf32, #tpu.memory_space<vmem>>, %arg9: memref<8x4x64xf32, #tpu.memory_space<vmem>>, %arg10: memref<8x4x64xf32, #tpu.memory_space<vmem>>) attributes {dimension_semantics = [], scalar_prefetch = 0 : i64, scratch_operands = 3 : i64, tpu.core_type = #tpu.core_type<tc>} {
    %c0 = arith.constant 0 : index
    %c0_0 = arith.constant 0 : index
    %c0_1 = arith.constant 0 : index
    %0 = vector.load %arg0[%c0, %c0_0, %c0_1] : memref<8x4x32xf32, #tpu.memory_space<vmem>>, vector<8x4x32xf32>
    %1 = vector.shape_cast %0 : vector<8x4x32xf32> to vector<32x32xf32>
    %c0_2 = arith.constant 0 : index
    %c0_3 = arith.constant 0 : index
    %2 = vector.load %arg1[%c0_2, %c0_3] : memref<32x512xf32, #tpu.memory_space<vmem>>, vector<32x512xf32>
    %cst = arith.constant dense<0.000000e+00> : vector<32x512xf32>
    %3 = tpu.matmul %1, %2, %cst {dimension_numbers = #tpu.dot_dimension_numbers<[1], [0], [0], [1], [0, 0, 1, 1], [], []>} : vector<32x32xf32>, vector<32x512xf32>, vector<32x512xf32> -> vector<32x512xf32>
    %c0_4 = arith.constant 0 : index
    %c0_5 = arith.constant 0 : index
    %4 = vector.load %arg3[%c0_4, %c0_5] : memref<1x512xf32, #tpu.memory_space<vmem>>, vector<1x512xf32>
    %5 = vector.broadcast %4 : vector<1x512xf32> to vector<32x512xf32>
    %6 = arith.addf %3, %5 : vector<32x512xf32>
    %7 = vector.shape_cast %6 : vector<32x512xf32> to vector<8x4x512xf32>
    %c0_6 = arith.constant 0 : index
    %c0_7 = arith.constant 0 : index
    %c0_8 = arith.constant 0 : index
    %8 = vector.load %arg8[%c0_6, %c0_7, %c0_8] : memref<8x4x512xf32, #tpu.memory_space<vmem>>, vector<8x4x512xf32>
    tpu.vector_store %arg8[%c0_6, %c0_7, %c0_8], %7 {strides = array<i32>} : memref<8x4x512xf32, #tpu.memory_space<vmem>>, vector<8x4x512xf32>,
    %c0_9 = arith.constant 0 : index
    %c0_10 = arith.constant 0 : index
    %9 = vector.load %arg2[%c0_9, %c0_10] : memref<64x512xf32, #tpu.memory_space<vmem>>, vector<64x512xf32>
    %10 = tpu.iota {dimensions = array<i32: 0>} : vector<8x256xi32>
    %c4_i32 = arith.constant 4 : i32
    %11 = vector.broadcast %c4_i32 : i32 to vector<8x256xi32>
    %12 = arith.cmpi slt, %10, %11 : vector<8x256xi32>
    %cst_11 = arith.constant 0.000000e+00 : f32
    %13 = vector.broadcast %cst_11 : f32 to vector<8x64xf32>
    %cst_12 = arith.constant 0.000000e+00 : f32
    %14 = vector.broadcast %cst_12 : f32 to vector<8x64xf32>
    %c0_i32 = arith.constant 0 : i32
    %15 = arith.index_cast %c0_i32 : i32 to index
    %c0_13 = arith.constant 0 : index
    %c0_14 = arith.constant 0 : index
    %16 = vector.load %arg8[%15, %c0_13, %c0_14] : memref<8x4x512xf32, #tpu.memory_space<vmem>>, vector<1x4x512xf32>
    %17 = vector.shape_cast %16 : vector<1x4x512xf32> to vector<4x512xf32>
    %c7_i32 = arith.constant 7 : i32
    %18 = arith.subi %c7_i32, %c0_i32 : i32
    %19 = arith.index_cast %18 : i32 to index
    %c0_15 = arith.constant 0 : index
    %c0_16 = arith.constant 0 : index
    %20 = vector.load %arg8[%19, %c0_15, %c0_16] : memref<8x4x512xf32, #tpu.memory_space<vmem>>, vector<1x4x512xf32>
    %21 = vector.shape_cast %20 : vector<1x4x512xf32> to vector<4x512xf32>
    %22 = vector.extract_strided_slice %17 {offsets = [0, 0], sizes = [4, 256], strides = [1, 1]} : vector<4x512xf32> to vector<4x256xf32>
    %23 = vector.extract_strided_slice %21 {offsets = [0, 256], sizes = [4, 256], strides = [1, 1]} : vector<4x512xf32> to vector<4x256xf32>
    %24 = tpu.concatenate %22, %23 in 0 : vector<4x256xf32>, vector<4x256xf32> -> vector<8x256xf32>
    %cst_17 = arith.constant dense<0.000000e+00> : vector<8x512xf32>
    %25 = tpu.matmul %13, %9, %cst_17 {dimension_numbers = #tpu.dot_dimension_numbers<[1], [0], [0], [1], [0, 0, 1, 1], [], []>} : vector<8x64xf32>, vector<64x512xf32>, vector<8x512xf32> -> vector<8x512xf32>
    %26 = vector.extract_strided_slice %25 {offsets = [0, 0], sizes = [8, 256], strides = [1, 1]} : vector<8x512xf32> to vector<8x256xf32>
    %27 = vector.extract_strided_slice %25 {offsets = [0, 256], sizes = [8, 256], strides = [1, 1]} : vector<8x512xf32> to vector<8x256xf32>
    %28 = arith.select %12, %26, %27 : vector<8x256xi1>, vector<8x256xf32>
    %29 = arith.addf %24, %28 : vector<8x256xf32>
    %30 = vector.extract_strided_slice %29 {offsets = [0, 0], sizes = [8, 192], strides = [1, 1]} : vector<8x256xf32> to vector<8x192xf32>
    %31 = arith.negf %30 : vector<8x192xf32>
    %32 = math.exp %31 : vector<8x192xf32>
    %cst_18 = arith.constant 1.000000e+00 : f32
    %33 = vector.broadcast %cst_18 : f32 to vector<8x192xf32>
    %34 = arith.addf %33, %32 : vector<8x192xf32>
    %35 = arith.divf %33, %34 : vector<8x192xf32>
    %36 = vector.extract_strided_slice %29 {offsets = [0, 192], sizes = [8, 64], strides = [1, 1]} : vector<8x256xf32> to vector<8x64xf32>
    %37 = math.tanh %36 : vector<8x64xf32>
    %38 = vector.extract_strided_slice %35 {offsets = [0, 0], sizes = [8, 64], strides = [1, 1]} : vector<8x192xf32> to vector<8x64xf32>
    %39 = vector.extract_strided_slice %35 {offsets = [0, 64], sizes = [8, 64], strides = [1, 1]} : vector<8x192xf32> to vector<8x64xf32>
    %40 = vector.extract_strided_slice %35 {offsets = [0, 128], sizes = [8, 64], strides = [1, 1]} : vector<8x192xf32> to vector<8x64xf32>
    %41 = arith.mulf %39, %14 : vector<8x64xf32>
    %42 = arith.mulf %38, %37 : vector<8x64xf32>
    %43 = arith.addf %41, %42 : vector<8x64xf32>
    %44 = math.tanh %43 : vector<8x64xf32>
    %45 = arith.mulf %40, %44 : vector<8x64xf32>
    %46 = vector.extract_strided_slice %45 {offsets = [0, 0], sizes = [4, 64], strides = [1, 1]} : vector<8x64xf32> to vector<4x64xf32>
    %47 = arith.index_cast %c0_i32 : i32 to index
    %c0_19 = arith.constant 0 : index
    %c0_20 = arith.constant 0 : index
    %48 = vector.load %arg9[%47, %c0_19, %c0_20] : memref<8x4x64xf32, #tpu.memory_space<vmem>>, vector<1x4x64xf32>
    %49 = vector.shape_cast %48 : vector<1x4x64xf32> to vector<4x64xf32>
    %50 = vector.shape_cast %46 : vector<4x64xf32> to vector<1x4x64xf32>
    tpu.vector_store %arg9[%47, %c0_19, %c0_20], %50 {strides = array<i32>} : memref<8x4x64xf32, #tpu.memory_space<vmem>>, vector<1x4x64xf32>,
    %51 = vector.extract_strided_slice %45 {offsets = [4, 0], sizes = [4, 64], strides = [1, 1]} : vector<8x64xf32> to vector<4x64xf32>
    %c7_i32_21 = arith.constant 7 : i32
    %52 = arith.subi %c7_i32_21, %c0_i32 : i32
    %53 = arith.index_cast %52 : i32 to index
    %c0_22 = arith.constant 0 : index
    %c0_23 = arith.constant 0 : index
    %54 = vector.load %arg10[%53, %c0_22, %c0_23] : memref<8x4x64xf32, #tpu.memory_space<vmem>>, vector<1x4x64xf32>
    %55 = vector.shape_cast %54 : vector<1x4x64xf32> to vector<4x64xf32>
    %56 = vector.shape_cast %51 : vector<4x64xf32> to vector<1x4x64xf32>
    tpu.vector_store %arg10[%53, %c0_22, %c0_23], %56 {strides = array<i32>} : memref<8x4x64xf32, #tpu.memory_space<vmem>>, vector<1x4x64xf32>,
    %c1_i32 = arith.constant 1 : i32
    %57 = arith.index_cast %c1_i32 : i32 to index
    %c0_24 = arith.constant 0 : index
    %c0_25 = arith.constant 0 : index
    %58 = vector.load %arg8[%57, %c0_24, %c0_25] : memref<8x4x512xf32, #tpu.memory_space<vmem>>, vector<1x4x512xf32>
    %59 = vector.shape_cast %58 : vector<1x4x512xf32> to vector<4x512xf32>
    %c7_i32_26 = arith.constant 7 : i32
    %60 = arith.subi %c7_i32_26, %c1_i32 : i32
    %61 = arith.index_cast %60 : i32 to index
    %c0_27 = arith.constant 0 : index
    %c0_28 = arith.constant 0 : index
    %62 = vector.load %arg8[%61, %c0_27, %c0_28] : memref<8x4x512xf32, #tpu.memory_space<vmem>>, vector<1x4x512xf32>
    %63 = vector.shape_cast %62 : vector<1x4x512xf32> to vector<4x512xf32>
    %64 = vector.extract_strided_slice %59 {offsets = [0, 0], sizes = [4, 256], strides = [1, 1]} : vector<4x512xf32> to vector<4x256xf32>
    %65 = vector.extract_strided_slice %63 {offsets = [0, 256], sizes = [4, 256], strides = [1, 1]} : vector<4x512xf32> to vector<4x256xf32>
    %66 = tpu.concatenate %64, %65 in 0 : vector<4x256xf32>, vector<4x256xf32> -> vector<8x256xf32>
    %cst_29 = arith.constant dense<0.000000e+00> : vector<8x512xf32>
    %67 = tpu.matmul %45, %9, %cst_29 {dimension_numbers = #tpu.dot_dimension_numbers<[1], [0], [0], [1], [0, 0, 1, 1], [], []>} : vector<8x64xf32>, vector<64x512xf32>, vector<8x512xf32> -> vector<8x512xf32>
    %68 = vector.extract_strided_slice %67 {offsets = [0, 0], sizes = [8, 256], strides = [1, 1]} : vector<8x512xf32> to vector<8x256xf32>
    %69 = vector.extract_strided_slice %67 {offsets = [0, 256], sizes = [8, 256], strides = [1, 1]} : vector<8x512xf32> to vector<8x256xf32>
    %70 = arith.select %12, %68, %69 : vector<8x256xi1>, vector<8x256xf32>
    %71 = arith.addf %66, %70 : vector<8x256xf32>
    %72 = vector.extract_strided_slice %71 {offsets = [0, 0], sizes = [8, 192], strides = [1, 1]} : vector<8x256xf32> to vector<8x192xf32>
    %73 = arith.negf %72 : vector<8x192xf32>
    %74 = math.exp %73 : vector<8x192xf32>
    %cst_30 = arith.constant 1.000000e+00 : f32
    %75 = vector.broadcast %cst_30 : f32 to vector<8x192xf32>
    %76 = arith.addf %75, %74 : vector<8x192xf32>
    %77 = arith.divf %75, %76 : vector<8x192xf32>
    %78 = vector.extract_strided_slice %71 {offsets = [0, 192], sizes = [8, 64], strides = [1, 1]} : vector<8x256xf32> to vector<8x64xf32>
    %79 = math.tanh %78 : vector<8x64xf32>
    %80 = vector.extract_strided_slice %77 {offsets = [0, 0], sizes = [8, 64], strides = [1, 1]} : vector<8x192xf32> to vector<8x64xf32>
    %81 = vector.extract_strided_slice %77 {offsets = [0, 64], sizes = [8, 64], strides = [1, 1]} : vector<8x192xf32> to vector<8x64xf32>
    %82 = vector.extract_strided_slice %77 {offsets = [0, 128], sizes = [8, 64], strides = [1, 1]} : vector<8x192xf32> to vector<8x64xf32>
    %83 = arith.mulf %81, %43 : vector<8x64xf32>
    %84 = arith.mulf %80, %79 : vector<8x64xf32>
    %85 = arith.addf %83, %84 : vector<8x64xf32>
    %86 = math.tanh %85 : vector<8x64xf32>
    %87 = arith.mulf %82, %86 : vector<8x64xf32>
    %88 = vector.extract_strided_slice %87 {offsets = [0, 0], sizes = [4, 64], strides = [1, 1]} : vector<8x64xf32> to vector<4x64xf32>
    %89 = arith.index_cast %c1_i32 : i32 to index
    %c0_31 = arith.constant 0 : index
    %c0_32 = arith.constant 0 : index
    %90 = vector.load %arg9[%89, %c0_31, %c0_32] : memref<8x4x64xf32, #tpu.memory_space<vmem>>, vector<1x4x64xf32>
    %91 = vector.shape_cast %90 : vector<1x4x64xf32> to vector<4x64xf32>
    %92 = vector.shape_cast %88 : vector<4x64xf32> to vector<1x4x64xf32>
    tpu.vector_store %arg9[%89, %c0_31, %c0_32], %92 {strides = array<i32>} : memref<8x4x64xf32, #tpu.memory_space<vmem>>, vector<1x4x64xf32>,
    %93 = vector.extract_strided_slice %87 {offsets = [4, 0], sizes = [4, 64], strides = [1, 1]} : vector<8x64xf32> to vector<4x64xf32>
    %c7_i32_33 = arith.constant 7 : i32
    %94 = arith.subi %c7_i32_33, %c1_i32 : i32
    %95 = arith.index_cast %94 : i32 to index
    %c0_34 = arith.constant 0 : index
    %c0_35 = arith.constant 0 : index
    %96 = vector.load %arg10[%95, %c0_34, %c0_35] : memref<8x4x64xf32, #tpu.memory_space<vmem>>, vector<1x4x64xf32>
    %97 = vector.shape_cast %96 : vector<1x4x64xf32> to vector<4x64xf32>
    %98 = vector.shape_cast %93 : vector<4x64xf32> to vector<1x4x64xf32>
    tpu.vector_store %arg10[%95, %c0_34, %c0_35], %98 {strides = array<i32>} : memref<8x4x64xf32, #tpu.memory_space<vmem>>, vector<1x4x64xf32>,
    %c2_i32 = arith.constant 2 : i32
    %99 = arith.index_cast %c2_i32 : i32 to index
    %c0_36 = arith.constant 0 : index
    %c0_37 = arith.constant 0 : index
    %100 = vector.load %arg8[%99, %c0_36, %c0_37] : memref<8x4x512xf32, #tpu.memory_space<vmem>>, vector<1x4x512xf32>
    %101 = vector.shape_cast %100 : vector<1x4x512xf32> to vector<4x512xf32>
    %c7_i32_38 = arith.constant 7 : i32
    %102 = arith.subi %c7_i32_38, %c2_i32 : i32
    %103 = arith.index_cast %102 : i32 to index
    %c0_39 = arith.constant 0 : index
    %c0_40 = arith.constant 0 : index
    %104 = vector.load %arg8[%103, %c0_39, %c0_40] : memref<8x4x512xf32, #tpu.memory_space<vmem>>, vector<1x4x512xf32>
    %105 = vector.shape_cast %104 : vector<1x4x512xf32> to vector<4x512xf32>
    %106 = vector.extract_strided_slice %101 {offsets = [0, 0], sizes = [4, 256], strides = [1, 1]} : vector<4x512xf32> to vector<4x256xf32>
    %107 = vector.extract_strided_slice %105 {offsets = [0, 256], sizes = [4, 256], strides = [1, 1]} : vector<4x512xf32> to vector<4x256xf32>
    %108 = tpu.concatenate %106, %107 in 0 : vector<4x256xf32>, vector<4x256xf32> -> vector<8x256xf32>
    %cst_41 = arith.constant dense<0.000000e+00> : vector<8x512xf32>
    %109 = tpu.matmul %87, %9, %cst_41 {dimension_numbers = #tpu.dot_dimension_numbers<[1], [0], [0], [1], [0, 0, 1, 1], [], []>} : vector<8x64xf32>, vector<64x512xf32>, vector<8x512xf32> -> vector<8x512xf32>
    %110 = vector.extract_strided_slice %109 {offsets = [0, 0], sizes = [8, 256], strides = [1, 1]} : vector<8x512xf32> to vector<8x256xf32>
    %111 = vector.extract_strided_slice %109 {offsets = [0, 256], sizes = [8, 256], strides = [1, 1]} : vector<8x512xf32> to vector<8x256xf32>
    %112 = arith.select %12, %110, %111 : vector<8x256xi1>, vector<8x256xf32>
    %113 = arith.addf %108, %112 : vector<8x256xf32>
    %114 = vector.extract_strided_slice %113 {offsets = [0, 0], sizes = [8, 192], strides = [1, 1]} : vector<8x256xf32> to vector<8x192xf32>
    %115 = arith.negf %114 : vector<8x192xf32>
    %116 = math.exp %115 : vector<8x192xf32>
    %cst_42 = arith.constant 1.000000e+00 : f32
    %117 = vector.broadcast %cst_42 : f32 to vector<8x192xf32>
    %118 = arith.addf %117, %116 : vector<8x192xf32>
    %119 = arith.divf %117, %118 : vector<8x192xf32>
    %120 = vector.extract_strided_slice %113 {offsets = [0, 192], sizes = [8, 64], strides = [1, 1]} : vector<8x256xf32> to vector<8x64xf32>
    %121 = math.tanh %120 : vector<8x64xf32>
    %122 = vector.extract_strided_slice %119 {offsets = [0, 0], sizes = [8, 64], strides = [1, 1]} : vector<8x192xf32> to vector<8x64xf32>
    %123 = vector.extract_strided_slice %119 {offsets = [0, 64], sizes = [8, 64], strides = [1, 1]} : vector<8x192xf32> to vector<8x64xf32>
    %124 = vector.extract_strided_slice %119 {offsets = [0, 128], sizes = [8, 64], strides = [1, 1]} : vector<8x192xf32> to vector<8x64xf32>
    %125 = arith.mulf %123, %85 : vector<8x64xf32>
    %126 = arith.mulf %122, %121 : vector<8x64xf32>
    %127 = arith.addf %125, %126 : vector<8x64xf32>
    %128 = math.tanh %127 : vector<8x64xf32>
    %129 = arith.mulf %124, %128 : vector<8x64xf32>
    %130 = vector.extract_strided_slice %129 {offsets = [0, 0], sizes = [4, 64], strides = [1, 1]} : vector<8x64xf32> to vector<4x64xf32>
    %131 = arith.index_cast %c2_i32 : i32 to index
    %c0_43 = arith.constant 0 : index
    %c0_44 = arith.constant 0 : index
    %132 = vector.load %arg9[%131, %c0_43, %c0_44] : memref<8x4x64xf32, #tpu.memory_space<vmem>>, vector<1x4x64xf32>
    %133 = vector.shape_cast %132 : vector<1x4x64xf32> to vector<4x64xf32>
    %134 = vector.shape_cast %130 : vector<4x64xf32> to vector<1x4x64xf32>
    tpu.vector_store %arg9[%131, %c0_43, %c0_44], %134 {strides = array<i32>} : memref<8x4x64xf32, #tpu.memory_space<vmem>>, vector<1x4x64xf32>,
    %135 = vector.extract_strided_slice %129 {offsets = [4, 0], sizes = [4, 64], strides = [1, 1]} : vector<8x64xf32> to vector<4x64xf32>
    %c7_i32_45 = arith.constant 7 : i32
    %136 = arith.subi %c7_i32_45, %c2_i32 : i32
    %137 = arith.index_cast %136 : i32 to index
    %c0_46 = arith.constant 0 : index
    %c0_47 = arith.constant 0 : index
    %138 = vector.load %arg10[%137, %c0_46, %c0_47] : memref<8x4x64xf32, #tpu.memory_space<vmem>>, vector<1x4x64xf32>
    %139 = vector.shape_cast %138 : vector<1x4x64xf32> to vector<4x64xf32>
    %140 = vector.shape_cast %135 : vector<4x64xf32> to vector<1x4x64xf32>
    tpu.vector_store %arg10[%137, %c0_46, %c0_47], %140 {strides = array<i32>} : memref<8x4x64xf32, #tpu.memory_space<vmem>>, vector<1x4x64xf32>,
    %c3_i32 = arith.constant 3 : i32
    %141 = arith.index_cast %c3_i32 : i32 to index
    %c0_48 = arith.constant 0 : index
    %c0_49 = arith.constant 0 : index
    %142 = vector.load %arg8[%141, %c0_48, %c0_49] : memref<8x4x512xf32, #tpu.memory_space<vmem>>, vector<1x4x512xf32>
    %143 = vector.shape_cast %142 : vector<1x4x512xf32> to vector<4x512xf32>
    %c7_i32_50 = arith.constant 7 : i32
    %144 = arith.subi %c7_i32_50, %c3_i32 : i32
    %145 = arith.index_cast %144 : i32 to index
    %c0_51 = arith.constant 0 : index
    %c0_52 = arith.constant 0 : index
    %146 = vector.load %arg8[%145, %c0_51, %c0_52] : memref<8x4x512xf32, #tpu.memory_space<vmem>>, vector<1x4x512xf32>
    %147 = vector.shape_cast %146 : vector<1x4x512xf32> to vector<4x512xf32>
    %148 = vector.extract_strided_slice %143 {offsets = [0, 0], sizes = [4, 256], strides = [1, 1]} : vector<4x512xf32> to vector<4x256xf32>
    %149 = vector.extract_strided_slice %147 {offsets = [0, 256], sizes = [4, 256], strides = [1, 1]} : vector<4x512xf32> to vector<4x256xf32>
    %150 = tpu.concatenate %148, %149 in 0 : vector<4x256xf32>, vector<4x256xf32> -> vector<8x256xf32>
    %cst_53 = arith.constant dense<0.000000e+00> : vector<8x512xf32>
    %151 = tpu.matmul %129, %9, %cst_53 {dimension_numbers = #tpu.dot_dimension_numbers<[1], [0], [0], [1], [0, 0, 1, 1], [], []>} : vector<8x64xf32>, vector<64x512xf32>, vector<8x512xf32> -> vector<8x512xf32>
    %152 = vector.extract_strided_slice %151 {offsets = [0, 0], sizes = [8, 256], strides = [1, 1]} : vector<8x512xf32> to vector<8x256xf32>
    %153 = vector.extract_strided_slice %151 {offsets = [0, 256], sizes = [8, 256], strides = [1, 1]} : vector<8x512xf32> to vector<8x256xf32>
    %154 = arith.select %12, %152, %153 : vector<8x256xi1>, vector<8x256xf32>
    %155 = arith.addf %150, %154 : vector<8x256xf32>
    %156 = vector.extract_strided_slice %155 {offsets = [0, 0], sizes = [8, 192], strides = [1, 1]} : vector<8x256xf32> to vector<8x192xf32>
    %157 = arith.negf %156 : vector<8x192xf32>
    %158 = math.exp %157 : vector<8x192xf32>
    %cst_54 = arith.constant 1.000000e+00 : f32
    %159 = vector.broadcast %cst_54 : f32 to vector<8x192xf32>
    %160 = arith.addf %159, %158 : vector<8x192xf32>
    %161 = arith.divf %159, %160 : vector<8x192xf32>
    %162 = vector.extract_strided_slice %155 {offsets = [0, 192], sizes = [8, 64], strides = [1, 1]} : vector<8x256xf32> to vector<8x64xf32>
    %163 = math.tanh %162 : vector<8x64xf32>
    %164 = vector.extract_strided_slice %161 {offsets = [0, 0], sizes = [8, 64], strides = [1, 1]} : vector<8x192xf32> to vector<8x64xf32>
    %165 = vector.extract_strided_slice %161 {offsets = [0, 64], sizes = [8, 64], strides = [1, 1]} : vector<8x192xf32> to vector<8x64xf32>
    %166 = vector.extract_strided_slice %161 {offsets = [0, 128], sizes = [8, 64], strides = [1, 1]} : vector<8x192xf32> to vector<8x64xf32>
    %167 = arith.mulf %165, %127 : vector<8x64xf32>
    %168 = arith.mulf %164, %163 : vector<8x64xf32>
    %169 = arith.addf %167, %168 : vector<8x64xf32>
    %170 = math.tanh %169 : vector<8x64xf32>
    %171 = arith.mulf %166, %170 : vector<8x64xf32>
    %172 = vector.extract_strided_slice %171 {offsets = [0, 0], sizes = [4, 64], strides = [1, 1]} : vector<8x64xf32> to vector<4x64xf32>
    %173 = arith.index_cast %c3_i32 : i32 to index
    %c0_55 = arith.constant 0 : index
    %c0_56 = arith.constant 0 : index
    %174 = vector.load %arg9[%173, %c0_55, %c0_56] : memref<8x4x64xf32, #tpu.memory_space<vmem>>, vector<1x4x64xf32>
    %175 = vector.shape_cast %174 : vector<1x4x64xf32> to vector<4x64xf32>
    %176 = vector.shape_cast %172 : vector<4x64xf32> to vector<1x4x64xf32>
    tpu.vector_store %arg9[%173, %c0_55, %c0_56], %176 {strides = array<i32>} : memref<8x4x64xf32, #tpu.memory_space<vmem>>, vector<1x4x64xf32>,
    %177 = vector.extract_strided_slice %171 {offsets = [4, 0], sizes = [4, 64], strides = [1, 1]} : vector<8x64xf32> to vector<4x64xf32>
    %c7_i32_57 = arith.constant 7 : i32
    %178 = arith.subi %c7_i32_57, %c3_i32 : i32
    %179 = arith.index_cast %178 : i32 to index
    %c0_58 = arith.constant 0 : index
    %c0_59 = arith.constant 0 : index
    %180 = vector.load %arg10[%179, %c0_58, %c0_59] : memref<8x4x64xf32, #tpu.memory_space<vmem>>, vector<1x4x64xf32>
    %181 = vector.shape_cast %180 : vector<1x4x64xf32> to vector<4x64xf32>
    %182 = vector.shape_cast %177 : vector<4x64xf32> to vector<1x4x64xf32>
    tpu.vector_store %arg10[%179, %c0_58, %c0_59], %182 {strides = array<i32>} : memref<8x4x64xf32, #tpu.memory_space<vmem>>, vector<1x4x64xf32>,
    %c4_i32_60 = arith.constant 4 : i32
    %183 = arith.index_cast %c4_i32_60 : i32 to index
    %c0_61 = arith.constant 0 : index
    %c0_62 = arith.constant 0 : index
    %184 = vector.load %arg8[%183, %c0_61, %c0_62] : memref<8x4x512xf32, #tpu.memory_space<vmem>>, vector<1x4x512xf32>
    %185 = vector.shape_cast %184 : vector<1x4x512xf32> to vector<4x512xf32>
    %c7_i32_63 = arith.constant 7 : i32
    %186 = arith.subi %c7_i32_63, %c4_i32_60 : i32
    %187 = arith.index_cast %186 : i32 to index
    %c0_64 = arith.constant 0 : index
    %c0_65 = arith.constant 0 : index
    %188 = vector.load %arg8[%187, %c0_64, %c0_65] : memref<8x4x512xf32, #tpu.memory_space<vmem>>, vector<1x4x512xf32>
    %189 = vector.shape_cast %188 : vector<1x4x512xf32> to vector<4x512xf32>
    %190 = vector.extract_strided_slice %185 {offsets = [0, 0], sizes = [4, 256], strides = [1, 1]} : vector<4x512xf32> to vector<4x256xf32>
    %191 = vector.extract_strided_slice %189 {offsets = [0, 256], sizes = [4, 256], strides = [1, 1]} : vector<4x512xf32> to vector<4x256xf32>
    %192 = tpu.concatenate %190, %191 in 0 : vector<4x256xf32>, vector<4x256xf32> -> vector<8x256xf32>
    %cst_66 = arith.constant dense<0.000000e+00> : vector<8x512xf32>
    %193 = tpu.matmul %171, %9, %cst_66 {dimension_numbers = #tpu.dot_dimension_numbers<[1], [0], [0], [1], [0, 0, 1, 1], [], []>} : vector<8x64xf32>, vector<64x512xf32>, vector<8x512xf32> -> vector<8x512xf32>
    %194 = vector.extract_strided_slice %193 {offsets = [0, 0], sizes = [8, 256], strides = [1, 1]} : vector<8x512xf32> to vector<8x256xf32>
    %195 = vector.extract_strided_slice %193 {offsets = [0, 256], sizes = [8, 256], strides = [1, 1]} : vector<8x512xf32> to vector<8x256xf32>
    %196 = arith.select %12, %194, %195 : vector<8x256xi1>, vector<8x256xf32>
    %197 = arith.addf %192, %196 : vector<8x256xf32>
    %198 = vector.extract_strided_slice %197 {offsets = [0, 0], sizes = [8, 192], strides = [1, 1]} : vector<8x256xf32> to vector<8x192xf32>
    %199 = arith.negf %198 : vector<8x192xf32>
    %200 = math.exp %199 : vector<8x192xf32>
    %cst_67 = arith.constant 1.000000e+00 : f32
    %201 = vector.broadcast %cst_67 : f32 to vector<8x192xf32>
    %202 = arith.addf %201, %200 : vector<8x192xf32>
    %203 = arith.divf %201, %202 : vector<8x192xf32>
    %204 = vector.extract_strided_slice %197 {offsets = [0, 192], sizes = [8, 64], strides = [1, 1]} : vector<8x256xf32> to vector<8x64xf32>
    %205 = math.tanh %204 : vector<8x64xf32>
    %206 = vector.extract_strided_slice %203 {offsets = [0, 0], sizes = [8, 64], strides = [1, 1]} : vector<8x192xf32> to vector<8x64xf32>
    %207 = vector.extract_strided_slice %203 {offsets = [0, 64], sizes = [8, 64], strides = [1, 1]} : vector<8x192xf32> to vector<8x64xf32>
    %208 = vector.extract_strided_slice %203 {offsets = [0, 128], sizes = [8, 64], strides = [1, 1]} : vector<8x192xf32> to vector<8x64xf32>
    %209 = arith.mulf %207, %169 : vector<8x64xf32>
    %210 = arith.mulf %206, %205 : vector<8x64xf32>
    %211 = arith.addf %209, %210 : vector<8x64xf32>
    %212 = math.tanh %211 : vector<8x64xf32>
    %213 = arith.mulf %208, %212 : vector<8x64xf32>
    %214 = vector.extract_strided_slice %213 {offsets = [0, 0], sizes = [4, 64], strides = [1, 1]} : vector<8x64xf32> to vector<4x64xf32>
    %215 = arith.index_cast %c4_i32_60 : i32 to index
    %c0_68 = arith.constant 0 : index
    %c0_69 = arith.constant 0 : index
    %216 = vector.load %arg9[%215, %c0_68, %c0_69] : memref<8x4x64xf32, #tpu.memory_space<vmem>>, vector<1x4x64xf32>
    %217 = vector.shape_cast %216 : vector<1x4x64xf32> to vector<4x64xf32>
    %218 = vector.shape_cast %214 : vector<4x64xf32> to vector<1x4x64xf32>
    tpu.vector_store %arg9[%215, %c0_68, %c0_69], %218 {strides = array<i32>} : memref<8x4x64xf32, #tpu.memory_space<vmem>>, vector<1x4x64xf32>,
    %219 = vector.extract_strided_slice %213 {offsets = [4, 0], sizes = [4, 64], strides = [1, 1]} : vector<8x64xf32> to vector<4x64xf32>
    %c7_i32_70 = arith.constant 7 : i32
    %220 = arith.subi %c7_i32_70, %c4_i32_60 : i32
    %221 = arith.index_cast %220 : i32 to index
    %c0_71 = arith.constant 0 : index
    %c0_72 = arith.constant 0 : index
    %222 = vector.load %arg10[%221, %c0_71, %c0_72] : memref<8x4x64xf32, #tpu.memory_space<vmem>>, vector<1x4x64xf32>
    %223 = vector.shape_cast %222 : vector<1x4x64xf32> to vector<4x64xf32>
    %224 = vector.shape_cast %219 : vector<4x64xf32> to vector<1x4x64xf32>
    tpu.vector_store %arg10[%221, %c0_71, %c0_72], %224 {strides = array<i32>} : memref<8x4x64xf32, #tpu.memory_space<vmem>>, vector<1x4x64xf32>,
    %c5_i32 = arith.constant 5 : i32
    %225 = arith.index_cast %c5_i32 : i32 to index
    %c0_73 = arith.constant 0 : index
    %c0_74 = arith.constant 0 : index
    %226 = vector.load %arg8[%225, %c0_73, %c0_74] : memref<8x4x512xf32, #tpu.memory_space<vmem>>, vector<1x4x512xf32>
    %227 = vector.shape_cast %226 : vector<1x4x512xf32> to vector<4x512xf32>
    %c7_i32_75 = arith.constant 7 : i32
    %228 = arith.subi %c7_i32_75, %c5_i32 : i32
    %229 = arith.index_cast %228 : i32 to index
    %c0_76 = arith.constant 0 : index
    %c0_77 = arith.constant 0 : index
    %230 = vector.load %arg8[%229, %c0_76, %c0_77] : memref<8x4x512xf32, #tpu.memory_space<vmem>>, vector<1x4x512xf32>
    %231 = vector.shape_cast %230 : vector<1x4x512xf32> to vector<4x512xf32>
    %232 = vector.extract_strided_slice %227 {offsets = [0, 0], sizes = [4, 256], strides = [1, 1]} : vector<4x512xf32> to vector<4x256xf32>
    %233 = vector.extract_strided_slice %231 {offsets = [0, 256], sizes = [4, 256], strides = [1, 1]} : vector<4x512xf32> to vector<4x256xf32>
    %234 = tpu.concatenate %232, %233 in 0 : vector<4x256xf32>, vector<4x256xf32> -> vector<8x256xf32>
    %cst_78 = arith.constant dense<0.000000e+00> : vector<8x512xf32>
    %235 = tpu.matmul %213, %9, %cst_78 {dimension_numbers = #tpu.dot_dimension_numbers<[1], [0], [0], [1], [0, 0, 1, 1], [], []>} : vector<8x64xf32>, vector<64x512xf32>, vector<8x512xf32> -> vector<8x512xf32>
    %236 = vector.extract_strided_slice %235 {offsets = [0, 0], sizes = [8, 256], strides = [1, 1]} : vector<8x512xf32> to vector<8x256xf32>
    %237 = vector.extract_strided_slice %235 {offsets = [0, 256], sizes = [8, 256], strides = [1, 1]} : vector<8x512xf32> to vector<8x256xf32>
    %238 = arith.select %12, %236, %237 : vector<8x256xi1>, vector<8x256xf32>
    %239 = arith.addf %234, %238 : vector<8x256xf32>
    %240 = vector.extract_strided_slice %239 {offsets = [0, 0], sizes = [8, 192], strides = [1, 1]} : vector<8x256xf32> to vector<8x192xf32>
    %241 = arith.negf %240 : vector<8x192xf32>
    %242 = math.exp %241 : vector<8x192xf32>
    %cst_79 = arith.constant 1.000000e+00 : f32
    %243 = vector.broadcast %cst_79 : f32 to vector<8x192xf32>
    %244 = arith.addf %243, %242 : vector<8x192xf32>
    %245 = arith.divf %243, %244 : vector<8x192xf32>
    %246 = vector.extract_strided_slice %239 {offsets = [0, 192], sizes = [8, 64], strides = [1, 1]} : vector<8x256xf32> to vector<8x64xf32>
    %247 = math.tanh %246 : vector<8x64xf32>
    %248 = vector.extract_strided_slice %245 {offsets = [0, 0], sizes = [8, 64], strides = [1, 1]} : vector<8x192xf32> to vector<8x64xf32>
    %249 = vector.extract_strided_slice %245 {offsets = [0, 64], sizes = [8, 64], strides = [1, 1]} : vector<8x192xf32> to vector<8x64xf32>
    %250 = vector.extract_strided_slice %245 {offsets = [0, 128], sizes = [8, 64], strides = [1, 1]} : vector<8x192xf32> to vector<8x64xf32>
    %251 = arith.mulf %249, %211 : vector<8x64xf32>
    %252 = arith.mulf %248, %247 : vector<8x64xf32>
    %253 = arith.addf %251, %252 : vector<8x64xf32>
    %254 = math.tanh %253 : vector<8x64xf32>
    %255 = arith.mulf %250, %254 : vector<8x64xf32>
    %256 = vector.extract_strided_slice %255 {offsets = [0, 0], sizes = [4, 64], strides = [1, 1]} : vector<8x64xf32> to vector<4x64xf32>
    %257 = arith.index_cast %c5_i32 : i32 to index
    %c0_80 = arith.constant 0 : index
    %c0_81 = arith.constant 0 : index
    %258 = vector.load %arg9[%257, %c0_80, %c0_81] : memref<8x4x64xf32, #tpu.memory_space<vmem>>, vector<1x4x64xf32>
    %259 = vector.shape_cast %258 : vector<1x4x64xf32> to vector<4x64xf32>
    %260 = vector.shape_cast %256 : vector<4x64xf32> to vector<1x4x64xf32>
    tpu.vector_store %arg9[%257, %c0_80, %c0_81], %260 {strides = array<i32>} : memref<8x4x64xf32, #tpu.memory_space<vmem>>, vector<1x4x64xf32>,
    %261 = vector.extract_strided_slice %255 {offsets = [4, 0], sizes = [4, 64], strides = [1, 1]} : vector<8x64xf32> to vector<4x64xf32>
    %c7_i32_82 = arith.constant 7 : i32
    %262 = arith.subi %c7_i32_82, %c5_i32 : i32
    %263 = arith.index_cast %262 : i32 to index
    %c0_83 = arith.constant 0 : index
    %c0_84 = arith.constant 0 : index
    %264 = vector.load %arg10[%263, %c0_83, %c0_84] : memref<8x4x64xf32, #tpu.memory_space<vmem>>, vector<1x4x64xf32>
    %265 = vector.shape_cast %264 : vector<1x4x64xf32> to vector<4x64xf32>
    %266 = vector.shape_cast %261 : vector<4x64xf32> to vector<1x4x64xf32>
    tpu.vector_store %arg10[%263, %c0_83, %c0_84], %266 {strides = array<i32>} : memref<8x4x64xf32, #tpu.memory_space<vmem>>, vector<1x4x64xf32>,
    %c6_i32 = arith.constant 6 : i32
    %267 = arith.index_cast %c6_i32 : i32 to index
    %c0_85 = arith.constant 0 : index
    %c0_86 = arith.constant 0 : index
    %268 = vector.load %arg8[%267, %c0_85, %c0_86] : memref<8x4x512xf32, #tpu.memory_space<vmem>>, vector<1x4x512xf32>
    %269 = vector.shape_cast %268 : vector<1x4x512xf32> to vector<4x512xf32>
    %c7_i32_87 = arith.constant 7 : i32
    %270 = arith.subi %c7_i32_87, %c6_i32 : i32
    %271 = arith.index_cast %270 : i32 to index
    %c0_88 = arith.constant 0 : index
    %c0_89 = arith.constant 0 : index
    %272 = vector.load %arg8[%271, %c0_88, %c0_89] : memref<8x4x512xf32, #tpu.memory_space<vmem>>, vector<1x4x512xf32>
    %273 = vector.shape_cast %272 : vector<1x4x512xf32> to vector<4x512xf32>
    %274 = vector.extract_strided_slice %269 {offsets = [0, 0], sizes = [4, 256], strides = [1, 1]} : vector<4x512xf32> to vector<4x256xf32>
    %275 = vector.extract_strided_slice %273 {offsets = [0, 256], sizes = [4, 256], strides = [1, 1]} : vector<4x512xf32> to vector<4x256xf32>
    %276 = tpu.concatenate %274, %275 in 0 : vector<4x256xf32>, vector<4x256xf32> -> vector<8x256xf32>
    %cst_90 = arith.constant dense<0.000000e+00> : vector<8x512xf32>
    %277 = tpu.matmul %255, %9, %cst_90 {dimension_numbers = #tpu.dot_dimension_numbers<[1], [0], [0], [1], [0, 0, 1, 1], [], []>} : vector<8x64xf32>, vector<64x512xf32>, vector<8x512xf32> -> vector<8x512xf32>
    %278 = vector.extract_strided_slice %277 {offsets = [0, 0], sizes = [8, 256], strides = [1, 1]} : vector<8x512xf32> to vector<8x256xf32>
    %279 = vector.extract_strided_slice %277 {offsets = [0, 256], sizes = [8, 256], strides = [1, 1]} : vector<8x512xf32> to vector<8x256xf32>
    %280 = arith.select %12, %278, %279 : vector<8x256xi1>, vector<8x256xf32>
    %281 = arith.addf %276, %280 : vector<8x256xf32>
    %282 = vector.extract_strided_slice %281 {offsets = [0, 0], sizes = [8, 192], strides = [1, 1]} : vector<8x256xf32> to vector<8x192xf32>
    %283 = arith.negf %282 : vector<8x192xf32>
    %284 = math.exp %283 : vector<8x192xf32>
    %cst_91 = arith.constant 1.000000e+00 : f32
    %285 = vector.broadcast %cst_91 : f32 to vector<8x192xf32>
    %286 = arith.addf %285, %284 : vector<8x192xf32>
    %287 = arith.divf %285, %286 : vector<8x192xf32>
    %288 = vector.extract_strided_slice %281 {offsets = [0, 192], sizes = [8, 64], strides = [1, 1]} : vector<8x256xf32> to vector<8x64xf32>
    %289 = math.tanh %288 : vector<8x64xf32>
    %290 = vector.extract_strided_slice %287 {offsets = [0, 0], sizes = [8, 64], strides = [1, 1]} : vector<8x192xf32> to vector<8x64xf32>
    %291 = vector.extract_strided_slice %287 {offsets = [0, 64], sizes = [8, 64], strides = [1, 1]} : vector<8x192xf32> to vector<8x64xf32>
    %292 = vector.extract_strided_slice %287 {offsets = [0, 128], sizes = [8, 64], strides = [1, 1]} : vector<8x192xf32> to vector<8x64xf32>
    %293 = arith.mulf %291, %253 : vector<8x64xf32>
    %294 = arith.mulf %290, %289 : vector<8x64xf32>
    %295 = arith.addf %293, %294 : vector<8x64xf32>
    %296 = math.tanh %295 : vector<8x64xf32>
    %297 = arith.mulf %292, %296 : vector<8x64xf32>
    %298 = vector.extract_strided_slice %297 {offsets = [0, 0], sizes = [4, 64], strides = [1, 1]} : vector<8x64xf32> to vector<4x64xf32>
    %299 = arith.index_cast %c6_i32 : i32 to index
    %c0_92 = arith.constant 0 : index
    %c0_93 = arith.constant 0 : index
    %300 = vector.load %arg9[%299, %c0_92, %c0_93] : memref<8x4x64xf32, #tpu.memory_space<vmem>>, vector<1x4x64xf32>
    %301 = vector.shape_cast %300 : vector<1x4x64xf32> to vector<4x64xf32>
    %302 = vector.shape_cast %298 : vector<4x64xf32> to vector<1x4x64xf32>
    tpu.vector_store %arg9[%299, %c0_92, %c0_93], %302 {strides = array<i32>} : memref<8x4x64xf32, #tpu.memory_space<vmem>>, vector<1x4x64xf32>,
    %303 = vector.extract_strided_slice %297 {offsets = [4, 0], sizes = [4, 64], strides = [1, 1]} : vector<8x64xf32> to vector<4x64xf32>
    %c7_i32_94 = arith.constant 7 : i32
    %304 = arith.subi %c7_i32_94, %c6_i32 : i32
    %305 = arith.index_cast %304 : i32 to index
    %c0_95 = arith.constant 0 : index
    %c0_96 = arith.constant 0 : index
    %306 = vector.load %arg10[%305, %c0_95, %c0_96] : memref<8x4x64xf32, #tpu.memory_space<vmem>>, vector<1x4x64xf32>
    %307 = vector.shape_cast %306 : vector<1x4x64xf32> to vector<4x64xf32>
    %308 = vector.shape_cast %303 : vector<4x64xf32> to vector<1x4x64xf32>
    tpu.vector_store %arg10[%305, %c0_95, %c0_96], %308 {strides = array<i32>} : memref<8x4x64xf32, #tpu.memory_space<vmem>>, vector<1x4x64xf32>,
    %c7_i32_97 = arith.constant 7 : i32
    %309 = arith.index_cast %c7_i32_97 : i32 to index
    %c0_98 = arith.constant 0 : index
    %c0_99 = arith.constant 0 : index
    %310 = vector.load %arg8[%309, %c0_98, %c0_99] : memref<8x4x512xf32, #tpu.memory_space<vmem>>, vector<1x4x512xf32>
    %311 = vector.shape_cast %310 : vector<1x4x512xf32> to vector<4x512xf32>
    %c7_i32_100 = arith.constant 7 : i32
    %312 = arith.subi %c7_i32_100, %c7_i32_97 : i32
    %313 = arith.index_cast %312 : i32 to index
    %c0_101 = arith.constant 0 : index
    %c0_102 = arith.constant 0 : index
    %314 = vector.load %arg8[%313, %c0_101, %c0_102] : memref<8x4x512xf32, #tpu.memory_space<vmem>>, vector<1x4x512xf32>
    %315 = vector.shape_cast %314 : vector<1x4x512xf32> to vector<4x512xf32>
    %316 = vector.extract_strided_slice %311 {offsets = [0, 0], sizes = [4, 256], strides = [1, 1]} : vector<4x512xf32> to vector<4x256xf32>
    %317 = vector.extract_strided_slice %315 {offsets = [0, 256], sizes = [4, 256], strides = [1, 1]} : vector<4x512xf32> to vector<4x256xf32>
    %318 = tpu.concatenate %316, %317 in 0 : vector<4x256xf32>, vector<4x256xf32> -> vector<8x256xf32>
    %cst_103 = arith.constant dense<0.000000e+00> : vector<8x512xf32>
    %319 = tpu.matmul %297, %9, %cst_103 {dimension_numbers = #tpu.dot_dimension_numbers<[1], [0], [0], [1], [0, 0, 1, 1], [], []>} : vector<8x64xf32>, vector<64x512xf32>, vector<8x512xf32> -> vector<8x512xf32>
    %320 = vector.extract_strided_slice %319 {offsets = [0, 0], sizes = [8, 256], strides = [1, 1]} : vector<8x512xf32> to vector<8x256xf32>
    %321 = vector.extract_strided_slice %319 {offsets = [0, 256], sizes = [8, 256], strides = [1, 1]} : vector<8x512xf32> to vector<8x256xf32>
    %322 = arith.select %12, %320, %321 : vector<8x256xi1>, vector<8x256xf32>
    %323 = arith.addf %318, %322 : vector<8x256xf32>
    %324 = vector.extract_strided_slice %323 {offsets = [0, 0], sizes = [8, 192], strides = [1, 1]} : vector<8x256xf32> to vector<8x192xf32>
    %325 = arith.negf %324 : vector<8x192xf32>
    %326 = math.exp %325 : vector<8x192xf32>
    %cst_104 = arith.constant 1.000000e+00 : f32
    %327 = vector.broadcast %cst_104 : f32 to vector<8x192xf32>
    %328 = arith.addf %327, %326 : vector<8x192xf32>
    %329 = arith.divf %327, %328 : vector<8x192xf32>
    %330 = vector.extract_strided_slice %323 {offsets = [0, 192], sizes = [8, 64], strides = [1, 1]} : vector<8x256xf32> to vector<8x64xf32>
    %331 = math.tanh %330 : vector<8x64xf32>
    %332 = vector.extract_strided_slice %329 {offsets = [0, 0], sizes = [8, 64], strides = [1, 1]} : vector<8x192xf32> to vector<8x64xf32>
    %333 = vector.extract_strided_slice %329 {offsets = [0, 64], sizes = [8, 64], strides = [1, 1]} : vector<8x192xf32> to vector<8x64xf32>
    %334 = vector.extract_strided_slice %329 {offsets = [0, 128], sizes = [8, 64], strides = [1, 1]} : vector<8x192xf32> to vector<8x64xf32>
    %335 = arith.mulf %333, %295 : vector<8x64xf32>
    %336 = arith.mulf %332, %331 : vector<8x64xf32>
    %337 = arith.addf %335, %336 : vector<8x64xf32>
    %338 = math.tanh %337 : vector<8x64xf32>
    %339 = arith.mulf %334, %338 : vector<8x64xf32>
    %340 = vector.extract_strided_slice %339 {offsets = [0, 0], sizes = [4, 64], strides = [1, 1]} : vector<8x64xf32> to vector<4x64xf32>
    %341 = arith.index_cast %c7_i32_97 : i32 to index
    %c0_105 = arith.constant 0 : index
    %c0_106 = arith.constant 0 : index
    %342 = vector.load %arg9[%341, %c0_105, %c0_106] : memref<8x4x64xf32, #tpu.memory_space<vmem>>, vector<1x4x64xf32>
    %343 = vector.shape_cast %342 : vector<1x4x64xf32> to vector<4x64xf32>
    %344 = vector.shape_cast %340 : vector<4x64xf32> to vector<1x4x64xf32>
    tpu.vector_store %arg9[%341, %c0_105, %c0_106], %344 {strides = array<i32>} : memref<8x4x64xf32, #tpu.memory_space<vmem>>, vector<1x4x64xf32>,
    %345 = vector.extract_strided_slice %339 {offsets = [4, 0], sizes = [4, 64], strides = [1, 1]} : vector<8x64xf32> to vector<4x64xf32>
    %c7_i32_107 = arith.constant 7 : i32
    %346 = arith.subi %c7_i32_107, %c7_i32_97 : i32
    %347 = arith.index_cast %346 : i32 to index
    %c0_108 = arith.constant 0 : index
    %c0_109 = arith.constant 0 : index
    %348 = vector.load %arg10[%347, %c0_108, %c0_109] : memref<8x4x64xf32, #tpu.memory_space<vmem>>, vector<1x4x64xf32>
    %349 = vector.shape_cast %348 : vector<1x4x64xf32> to vector<4x64xf32>
    %350 = vector.shape_cast %345 : vector<4x64xf32> to vector<1x4x64xf32>
    tpu.vector_store %arg10[%347, %c0_108, %c0_109], %350 {strides = array<i32>} : memref<8x4x64xf32, #tpu.memory_space<vmem>>, vector<1x4x64xf32>,
    %c8_i32 = arith.constant 8 : i32
    %c0_110 = arith.constant 0 : index
    %c0_111 = arith.constant 0 : index
    %c0_112 = arith.constant 0 : index
    %351 = vector.load %arg9[%c0_110, %c0_111, %c0_112] : memref<8x4x64xf32, #tpu.memory_space<vmem>>, vector<8x4x64xf32>
    %c0_113 = arith.constant 0 : index
    %c0_114 = arith.constant 0 : index
    %c0_115 = arith.constant 0 : index
    %352 = vector.load %arg10[%c0_113, %c0_114, %c0_115] : memref<8x4x64xf32, #tpu.memory_space<vmem>>, vector<8x4x64xf32>
    %353 = tpu.concatenate %351, %352 in 2 : vector<8x4x64xf32>, vector<8x4x64xf32> -> vector<8x4x128xf32>
    %c0_116 = arith.constant 0 : index
    %c0_117 = arith.constant 0 : index
    %c0_118 = arith.constant 0 : index
    %354 = vector.load %arg7[%c0_116, %c0_117, %c0_118] : memref<8x4x128xf32, #tpu.memory_space<vmem>>, vector<8x4x128xf32>
    tpu.vector_store %arg7[%c0_116, %c0_117, %c0_118], %353 {strides = array<i32>} : memref<8x4x128xf32, #tpu.memory_space<vmem>>, vector<8x4x128xf32>,
    %c0_119 = arith.constant 0 : index
    %c0_120 = arith.constant 0 : index
    %355 = vector.load %arg4[%c0_119, %c0_120] : memref<1x128xf32, #tpu.memory_space<vmem>>, vector<1x128xf32>
    %356 = vector.shape_cast %355 : vector<1x128xf32> to vector<1x1x128xf32>
    %357 = vector.broadcast %356 : vector<1x1x128xf32> to vector<8x4x128xf32>
    %358 = arith.mulf %353, %357 : vector<8x4x128xf32>
    %cst_121 = arith.constant dense<0.000000e+00> : vector<8x4xf32>
    %359 = vector.multi_reduction <add>, %358, %cst_121 [2] : vector<8x4x128xf32> to vector<8x4xf32>
    %360 = vector.shape_cast %359 : vector<8x4xf32> to vector<8x4x1xf32>
    %c0_122 = arith.constant 0 : index
    %c0_123 = arith.constant 0 : index
    %361 = vector.load %arg5[%c0_122, %c0_123] : memref<1x1xf32, #tpu.memory_space<vmem>>, vector<1x1xf32>
    %362 = vector.shape_cast %361 : vector<1x1xf32> to vector<1x1x1xf32>
    %363 = vector.broadcast %362 : vector<1x1x1xf32> to vector<8x4x1xf32>
    %364 = arith.addf %360, %363 : vector<8x4x1xf32>
    %cst_124 = arith.constant dense<0xFF800000> : vector<4x1xf32>
    %365 = vector.multi_reduction <maximumf>, %364, %cst_124 [0] : vector<8x4x1xf32> to vector<4x1xf32>
    %366 = vector.shape_cast %365 : vector<4x1xf32> to vector<1x4x1xf32>
    %367 = vector.broadcast %366 : vector<1x4x1xf32> to vector<8x4x1xf32>
    %368 = arith.subf %364, %367 : vector<8x4x1xf32>
    %369 = math.exp %368 : vector<8x4x1xf32>
    %cst_125 = arith.constant dense<0.000000e+00> : vector<4x1xf32>
    %370 = vector.multi_reduction <add>, %369, %cst_125 [0] : vector<8x4x1xf32> to vector<4x1xf32>
    %371 = vector.shape_cast %370 : vector<4x1xf32> to vector<1x4x1xf32>
    %372 = vector.broadcast %371 : vector<1x4x1xf32> to vector<8x4x1xf32>
    %373 = arith.divf %369, %372 : vector<8x4x1xf32>
    %374 = vector.broadcast %373 : vector<8x4x1xf32> to vector<8x4x128xf32>
    %375 = arith.mulf %353, %374 : vector<8x4x128xf32>
    %cst_126 = arith.constant dense<0.000000e+00> : vector<4x128xf32>
    %376 = vector.multi_reduction <add>, %375, %cst_126 [0] : vector<8x4x128xf32> to vector<4x128xf32>
    %c0_127 = arith.constant 0 : index
    %c0_128 = arith.constant 0 : index
    %377 = vector.load %arg6[%c0_127, %c0_128] : memref<4x128xf32, #tpu.memory_space<vmem>>, vector<4x128xf32>
    tpu.vector_store %arg6[%c0_127, %c0_128], %376 {strides = array<i32>} : memref<4x128xf32, #tpu.memory_space<vmem>>, vector<4x128xf32>,
    return
  }
}

</mosaic_0001>

<bundles_post_ra>
// kernel: tpu_custom_call.1
= control target key start
LH: loop header
LB: loop body
LE: loop exit
PB: predicated region body
PF: predicated region fallthrough
CT: control target
= control target key end

     0   :  { %s3188_s0 = inlined_call_operand.hbm [shape: f32[8,4,32], index: 0, kind: input, shape index: {}]   ;;  %s3189_s1 = inlined_call_operand.hbm [shape: f32[32,512], index: 1, kind: input, shape index: {}]   ;;  %s3190_s2 = inlined_call_operand.hbm [shape: f32[64,512], index: 2, kind: input, shape index: {}]   ;;  %s3191_s3 = inlined_call_operand.vmem [shape: f32[1,512], index: 3, kind: input, shape index: {}]   ;;  %s3192_s4 = inlined_call_operand.vmem [shape: f32[1,128], index: 4, kind: input, shape index: {}]   ;;  %s3193_s5 = inlined_call_operand.<no memory space> [shape: f32[1,1], index: 5, kind: input, shape index: {}]   ;;  %s3194_s6 = inlined_call_operand.hbm [shape: f32[4,128], index: 6, kind: output, shape index: {0}]   ;;  %s3195_s7 = inlined_call_operand.hbm [shape: f32[8,4,128], index: 7, kind: output, shape index: {1}]  }
   0x1   :  { %v13_v0 = vstv %s3193_s5 }
   0x2   :  { %14 = vst [vmem:[#allocation5] sm:$0x1] %v13_v0 }
   0x3   :  { %15 = vsyncpa [#allocation7], 0 }
   0x4   :  { %16 = vsyncpa [#allocation10], 0 }
   0x5   :  { %17 = vsyncpa [#allocation8], 0  ;;  %s36_s28 = sshll.u32 %s3189_s1, 4  ;;  %s37_s28 = int_to_ptr.hbm [resolvable:$true] %s36_s28 }
   0x6   :  { %18 = vsyncpa [#allocation14], 0  ;;  %s2337_s29 = smov [#allocation9]   ;;  %s23_s10 = sshll.u32 %s3188_s0, 4  ;;  %s24_s10 = int_to_ptr.hbm [resolvable:$true] %s23_s10 }
   0x7   :  { %s38_s30 = sshll.u32 %s2337_s29, 4  ;;  %s2338_s11 = smov 512   ;;  %s39_s30 = int_to_ptr.vmem [resolvable:$true] %s38_s30 }
   0x8   :  { %s2339_s12 = smov 32   ;;  %s2340_s5 = smov [#allocation6]  }
   0x9   :  { %44 = dma.hbm_to_vmem [thread:$0]  %s37_s28, 2048, %s39_s30, [#allocation10], %s2338_s11, %s2338_s11, %s2339_s12  }
   0xa   :  { %s25_s13 = sshll.u32 %s2340_s5, 4  ;;  %s2341_s14 = smov 64   ;;  %s26_s13 = int_to_ptr.vmem [resolvable:$true] %s25_s13 }
   0xb   :  { %s2342_s15 = smov 4   ;;  %s49_s17 = sshll.u32 %s3190_s2, 4  ;;  %s50_s17 = int_to_ptr.hbm [resolvable:$true] %s49_s17 }
   0xc   :  { %31 = dma.hbm_to_vmem [thread:$0]  %s24_s10, 512, %s26_s13, [#allocation7], %s2341_s14, %s2341_s14, %s2342_s15  }
   0xd   :  { %s2343_s18 = smov [#allocation11]  }
   0xe   :  { %s51_s0 = sshll.u32 %s2343_s18, 4  ;;  %s52_s0 = int_to_ptr.vmem [resolvable:$true] %s51_s0 }
   0xf   :  { %57 = dma.hbm_to_vmem [thread:$0]  %s50_s17, 4096, %s52_s0, [#allocation10], %s2338_s11, %s2338_s11, %s2339_s12  }
  0x10   :  { %2329 = dma.done.wait [#allocation7], 512  }
  0x11   :  { %2330 = vsyncadd [#allocation7], 4294966784 }
  0x12   :  { %2331 = dma.done.wait [#allocation10], 6144  }
  0x13   :  { %2332 = vsyncadd [#allocation10], 4294961152  ;;  %v99_v1 = vld [vmem:[#allocation9 + $0x78] sm:$0xff]  ;;  %v98_v2 = vld [vmem:[#allocation9 + $0x70] sm:$0xff]  ;;  %vm137_vm0 = vcmask 261120   ;;  %v2344_v61 = vmov 0.0  }
  0x14   :  { %v95_v3 = vld [vmem:[#allocation9 + $0x58] sm:$0xff]  ;;  %245 = vmatpush.msra.mxu3 %v99_v1  ;;  %216 = vmatpush.msra.mxu2 %v98_v2  ;;  %v94_v4 = vld [vmem:[#allocation9 + $0x50] sm:$0xff]  ;;  %v76_v8 = vld [vmem:[#allocation6] sm:$0xf]  ;;  %vm286_vm1 = vcmask 1043456   ;;  %vm540_vm11 = vcmask 519168  }
  0x15   :  { %v91_v5 = vld [vmem:[#allocation9 + $0x38] sm:$0xff]  ;;  %v90_v6 = vld [vmem:[#allocation9 + $0x30] sm:$0xff]  ;;  %v77_v9 = vld [vmem:[#allocation6 + $0x4] sm:$0xf]  ;;  %118 = vst [vmem:[#allocation1] ss:$2 sm:$0xff] %v76_v8 }
  0x16   :  { %v87_v7 = vld [vmem:[#allocation9 + $0x18] sm:$0xff]  ;;  %246 = vmatpush.msra.mxu3 %v95_v3  ;;  %217 = vmatpush.msra.mxu2 %v94_v4  ;;  %v86_v10 = vld [vmem:[#allocation9 + $0x10] sm:$0xff]  ;;  %v96_v11 = vld [vmem:[#allocation9 + $0x60] sm:$0xff]  ;;  %120 = vst [vmem:[#allocation1 + $0x1] ss:$2 sm:$0xff] %v77_v9  ;;  %vm396_vm12 = vcmask 523264  }
  0x17   :  { %v97_v12 = vld [vmem:[#allocation9 + $0x68] sm:$0xff]  ;;  %158 = vmatpush.msra.mxu0 %v96_v11  ;;  %v2403_v13 = vld [vmem:[#allocation11 + $0xf8] sm:$0xff]  ;;  %v92_v14 = vld [vmem:[#allocation9 + $0x40] sm:$0xff]  ;;  %vm543_vm13 = vcmask 523268   ;;  %s1968_s24 = sshll.u32 %s3195_s7, 4  ;;  %s2347_s7 = smov [#allocation12]   ;;  %s1969_s24 = int_to_ptr.hbm [resolvable:$true] %s1968_s24 }
  0x18   :  { %187 = vmatpush.msra.mxu1 %v97_v12  ;;  %v93_v15 = vld [vmem:[#allocation9 + $0x48] sm:$0xff]  ;;  %247 = vmatpush.msra.mxu3 %v91_v5  ;;  %v88_v18 = vld [vmem:[#allocation9 + $0x20] sm:$0xff]  ;;  %v2405_v20 = vld [vmem:[#allocation11 + $0xd8] sm:$0xff]  ;;  %s1956_s25 = sshll.u32 %s2347_s7, 4  ;;  %s1958_s28 = sshll.u32 %s3194_s6, 4  ;;  %s1957_s25 = int_to_ptr.vmem [resolvable:$true] %s1956_s25  ;;  %s1959_s28 = int_to_ptr.hbm [resolvable:$true] %s1958_s28 }
  0x19   :  { %218 = vmatpush.msra.mxu2 %v90_v6  ;;  %v78_v16 = vld [vmem:[#allocation6 + $0x8] sm:$0xf]  ;;  %v79_v17 = vld [vmem:[#allocation6 + $0xc] sm:$0xf]  ;;  %159 = vmatpush.msra.mxu0 %v92_v14  ;;  %v84_v21 = vld [vmem:[#allocation9] sm:$0xff] }
  0x1a   :  { %188 = vmatpush.msra.mxu1 %v93_v15  ;;  %122 = vst [vmem:[#allocation1 + $0x10] ss:$2 sm:$0xff] %v78_v16  ;;  %v89_v19 = vld [vmem:[#allocation9 + $0x28] sm:$0xff]  ;;  %248 = vmatpush.msra.mxu3 %v87_v7  ;;  %v80_v23 = vld [vmem:[#allocation6 + $0x10] sm:$0xf]  ;;  %v2411_v29 = vld [vmem:[#allocation11 + $0xb8] sm:$0xff] }
  0x1b   :  { %219 = vmatpush.msra.mxu2 %v86_v10  ;;  %124 = vst [vmem:[#allocation1 + $0x11] ss:$2 sm:$0xff] %v79_v17  ;;  %160 = vmatpush.msra.mxu0 %v88_v18  ;;  %v85_v22 = vld [vmem:[#allocation9 + $0x8] sm:$0xff]  ;;  %v81_v24 = vld [vmem:[#allocation6 + $0x14] sm:$0xf]  ;;  %v2421_v32 = vld [vmem:[#allocation11 + $0x98] sm:$0xff] }
  0x1c   :  { %468 = vmatpush.msrb.mxu3 %v2403_v13  ;;  %189 = vmatpush.msra.mxu1 %v89_v19  ;;  %v2408_v25 = vld [vmem:[#allocation11 + $0xe8] sm:$0xff]  ;;  %126 = vst [vmem:[#allocation1 + $0x20] ss:$2 sm:$0xff] %v80_v23  ;;  %v82_v26 = vld [vmem:[#allocation6 + $0x18] sm:$0xf]  ;;  %v2415_v30 = vld [vmem:[#allocation11 + $0xf0] sm:$0xff] }
  0x1d   :  { %161 = vmatpush.msra.mxu0 %v84_v21  ;;  %128 = vst [vmem:[#allocation1 + $0x21] ss:$2 sm:$0xff] %v81_v24  ;;  %v83_v27 = vld [vmem:[#allocation6 + $0x1c] sm:$0xf]  ;;  %v2419_v31 = vld [vmem:[#allocation11 + $0xc8] sm:$0xff]  ;;  %v2423_v33 = vld [vmem:[#allocation11 + $0xe0] sm:$0xff]  ;;  %448 = vmatpush.msrb.mxu2 %v2415_v30 }
  0x1e   :  { %469 = vmatpush.msrb.mxu3 %v2405_v20  ;;  %v133_v28 = vld.sshfl [vmem:[#allocation1] sm:$0xff pattern:$0x75316420]  ;;  %190 = vmatpush.msra.mxu1 %v85_v22  ;;  %130 = vst [vmem:[#allocation1 + $0x30] ss:$2 sm:$0xff] %v82_v26  ;;  %v2429_v35 = vld [vmem:[#allocation11 + $0xa8] sm:$0xff] }
  0x1f   :  { %1999 = vmatmul.msk.f32.vlgmr.msra.gmra.mxu3 %vm137_vm0, %v133_v28  ;;  %1995 = vmatmul.msk.f32.vlgmr.msra.gmra.mxu2 %vm137_vm0, %v133_v28  ;;  %132 = vst [vmem:[#allocation1 + $0x31] ss:$2 sm:$0xff] %v83_v27  ;;  %v2427_v34 = vld [vmem:[#allocation11 + $0xd0] sm:$0xff]  ;;  %v2431_v36 = vld [vmem:[#allocation11 + $0x78] sm:$0xff]  ;;  %v2435_v37 = vld [vmem:[#allocation11 + $0xc0] sm:$0xff] }
  0x20   :  { %1987 = vmatmul.msk.f32.vlgmr.msra.gmra.mxu0 %vm137_vm0, %v133_v28  ;;  %1991 = vmatmul.msk.f32.vlgmr.msra.gmra.mxu1 %vm137_vm0, %v133_v28  ;;  %v2439_v38 = vld [vmem:[#allocation11 + $0xb0] sm:$0xff]  ;;  %v2441_v39 = vld [vmem:[#allocation11 + $0xa0] sm:$0xff]  ;;  %v2447_v41 = vld [vmem:[#allocation11 + $0x88] sm:$0xff] }
  0x21   :  { %428 = vmatpush.msrb.mxu1 %v2408_v25  ;;  %470 = vmatpush.msrb.mxu3 %v2411_v29  ;;  %v2449_v42 = vld [vmem:[#allocation11 + $0x58] sm:$0xff]  ;;  %v2455_v43 = vld [vmem:[#allocation11 + $0x68] sm:$0xff]  ;;  %v2457_v44 = vld [vmem:[#allocation11 + $0x90] sm:$0xff] }
  0x22   :  { %408 = vmatpush.msrb.mxu0 %v2423_v33  ;;  %v134_v40 = vld.sshfl [vmem:[#allocation1 + $0x10] sm:$0xff pattern:$0x75316420]  ;;  %449 = vmatpush.msrb.mxu2 %v2427_v34  ;;  %v2463_v46 = vld [vmem:[#allocation11 + $0x38] sm:$0xff]  ;;  %v2467_v47 = vld [vmem:[#allocation11 + $0x70] sm:$0xff] }
  0x23   :  { %429 = vmatpush.msrb.mxu1 %v2419_v31  ;;  %471 = vmatpush.msrb.mxu3 %v2421_v32  ;;  %v2459_v45 = vld [vmem:[#allocation11 + $0x80] sm:$0xff]  ;;  %v2472_v49 = vld [vmem:[#allocation11 + $0x48] sm:$0xff]  ;;  %v2474_v50 = vld [vmem:[#allocation11 + $0x18] sm:$0xff] }
  0x24   :  { %409 = vmatpush.msrb.mxu0 %v2435_v37  ;;  %450 = vmatpush.msrb.mxu2 %v2439_v38  ;;  %v2469_v48 = vld [vmem:[#allocation11 + $0x60] sm:$0xff]  ;;  %3200 = vst [vmem:[#allocation19_spill] sm:$0xff] %v2474_v50  ;;  %v2479_v51 = vld [vmem:[#allocation11 + $0x50] sm:$0xff]  ;;  %v2490_v55 = vld [vmem:[#allocation11 + $0x28] sm:$0xff] }
  0x25   :  { %430 = vmatpush.msrb.mxu1 %v2429_v35  ;;  %472 = vmatpush.msrb.mxu3 %v2431_v36  ;;  %v2481_v52 = vld [vmem:[#allocation11 + $0x40] sm:$0xff]  ;;  %v135_v53 = vld.sshfl [vmem:[#allocation1 + $0x20] sm:$0xff pattern:$0x75316420]  ;;  %v2501_v58 = vld [vmem:[#allocation11 + $0x8] sm:$0xff] }
  0x26   :  { %410 = vmatpush.msrb.mxu0 %v2441_v39  ;;  %451 = vmatpush.msrb.mxu2 %v2457_v44  ;;  %v2488_v54 = vld [vmem:[#allocation11 + $0x30] sm:$0xff]  ;;  %v2495_v56 = vld [vmem:[#allocation11 + $0x20] sm:$0xff] }
  0x27   :  { %2000 = vmatmul.msk.f32.gmra.mxu3 %vm137_vm0, %v134_v40  ;;  %1996 = vmatmul.msk.f32.gmra.mxu2 %vm137_vm0, %v134_v40  ;;  %v2499_v57 = vld [vmem:[#allocation11 + $0x10] sm:$0xff]  ;;  %v2505_v59 = vld [vmem:[#allocation11] sm:$0xff] }
  0x28   :  { %1988 = vmatmul.msk.f32.gmra.mxu0 %vm137_vm0, %v134_v40  ;;  %1992 = vmatmul.msk.f32.gmra.mxu1 %vm137_vm0, %v134_v40  ;;  %3201 = vst [vmem:[#allocation20_spill] sm:$0xff] %v2499_v57  ;;  %v136_v60 = vld.sshfl [vmem:[#allocation1 + $0x30] sm:$0xff pattern:$0x75316420]  ;;  %v100_v62 = vld [vmem:[%s3191_s3] sm:$0xf] }
  0x29   :  { %431 = vmatpush.msrb.mxu1 %v2447_v41  ;;  %473 = vmatpush.msrb.mxu3 %v2449_v42  ;;  %v2582_v63 = vperm.slane %v100_v62, 0  ;;  %v2584_v0 = vperm.slane %v100_v62, 1  ;;  %v2588_v5 = vperm.slane %v100_v62, 3  ;;  %v2590_v6 = vperm.slane %v100_v62, 2 }
  0x2a   :  { %411 = vmatpush.msrb.mxu0 %v2459_v45  ;;  %452 = vmatpush.msrb.mxu2 %v2467_v47 }
  0x2b   :  { %432 = vmatpush.msrb.mxu1 %v2455_v43  ;;  %474 = vmatpush.msrb.mxu3 %v2463_v46 }
  0x2c   :  { %412 = vmatpush.msrb.mxu0 %v2469_v48  ;;  %453 = vmatpush.msrb.mxu2 %v2479_v51 }
  0x2d   :  { %433 = vmatpush.msrb.mxu1 %v2472_v49  ;;  %475 = vmatpush.msrb.mxu3 %v2474_v50 }
  0x2e   :  { %413 = vmatpush.msrb.mxu0 %v2481_v52  ;;  %454 = vmatpush.msrb.mxu2 %v2488_v54 }
  0x2f   :  { %2001 = vmatmul.msk.f32.gmra.mxu3 %vm137_vm0, %v135_v53  ;;  %1997 = vmatmul.msk.f32.gmra.mxu2 %vm137_vm0, %v135_v53 }
  0x30   :  { %1989 = vmatmul.msk.f32.gmra.mxu0 %vm137_vm0, %v135_v53  ;;  %1993 = vmatmul.msk.f32.gmra.mxu1 %vm137_vm0, %v135_v53 }
  0x31   :  { %434 = vmatpush.msrb.mxu1 %v2490_v55  ;;  %414 = vmatpush.msrb.mxu0 %v2495_v56 }
  0x32   :  { %635 = vmatpush.msra.mxu3 %v2403_v13  ;;  %455 = vmatpush.msrb.mxu2 %v2499_v57 }
  0x33   :  { %435 = vmatpush.msrb.mxu1 %v2501_v58  ;;  %415 = vmatpush.msrb.mxu0 %v2505_v59 }
  0x34   :  { %615 = vmatpush.msra.mxu2 %v2415_v30  ;;  %636 = vmatpush.msra.mxu3 %v2405_v20 }
  0x35   :  { %595 = vmatpush.msra.mxu1 %v2408_v25  ;;  %575 = vmatpush.msra.mxu0 %v2423_v33 }
  0x36   :  { %616 = vmatpush.msra.mxu2 %v2427_v34  ;;  %637 = vmatpush.msra.mxu3 %v2411_v29 }
  0x37   :  { %596 = vmatpush.msra.mxu1 %v2419_v31  ;;  %2002 = vmatmul.msk.f32.gmra.mxu3 %vm137_vm0, %v136_v60 }
  0x38   :  { %1998 = vmatmul.msk.f32.gmra.mxu2 %vm137_vm0, %v136_v60  ;;  %1990 = vmatmul.msk.f32.gmra.mxu0 %vm137_vm0, %v136_v60 }
  0x39   :  { %1994 = vmatmul.msk.f32.gmra.mxu1 %vm137_vm0, %v136_v60  ;;  %576 = vmatpush.msra.mxu0 %v2435_v37 }
  0x3a   :  { %597 = vmatpush.msra.mxu1 %v2429_v35  ;;  %617 = vmatpush.msra.mxu2 %v2439_v38 }
  0x3b   :  { %577 = vmatpush.msra.mxu0 %v2441_v39  ;;  %638 = vmatpush.msra.mxu3 %v2421_v32 }
  0x3c   :  { %598 = vmatpush.msra.mxu1 %v2447_v41  ;;  %618 = vmatpush.msra.mxu2 %v2457_v44 }
  0x3d   :  { %578 = vmatpush.msra.mxu0 %v2459_v45  ;;  %639 = vmatpush.msra.mxu3 %v2431_v36 }
  0x3e   :  { %599 = vmatpush.msra.mxu1 %v2455_v43  ;;  %619 = vmatpush.msra.mxu2 %v2467_v47 }
  0x3f   :  { %476 = vmatmul.f32.vlgmr.msrb.gmra.mxu3 %v2344_v61  ;;  %579 = vmatpush.msra.mxu0 %v2469_v48 }
  0x40   :  { %456 = vmatmul.f32.vlgmr.msrb.gmra.mxu2 %v2344_v61  ;;  %416 = vmatmul.f32.vlgmr.msrb.gmra.mxu0 %v2344_v61 }
  0x41   :  { %436 = vmatmul.f32.vlgmr.msrb.gmra.mxu1 %v2344_v61  ;;  %640 = vmatpush.msra.mxu3 %v2449_v42 }
  0x42   :  { %600 = vmatpush.msra.mxu1 %v2472_v49  ;;  %580 = vmatpush.msra.mxu0 %v2481_v52 }
  0x43   :  { %620 = vmatpush.msra.mxu2 %v2479_v51  ;;  %641 = vmatpush.msra.mxu3 %v2463_v46 }
  0x44   :  { %601 = vmatpush.msra.mxu1 %v2490_v55  ;;  %581 = vmatpush.msra.mxu0 %v2495_v56 }
  0x45   :  { %621 = vmatpush.msra.mxu2 %v2488_v54  ;;  %642 = vmatpush.msra.mxu3 %v2474_v50 }
  0x46   :  { %602 = vmatpush.msra.mxu1 %v2501_v58  ;;  %582 = vmatpush.msra.mxu0 %v2505_v59 }
  0x47   :  { %622 = vmatpush.msra.mxu2 %v2499_v57  ;;  %801 = vmatpush.msrb.mxu3 %v2403_v13 }
  0x48   :  { %741 = vmatpush.msrb.mxu0 %v2423_v33  ;;  %761 = vmatpush.msrb.mxu1 %v2408_v25 }
  0x49   :  { %781 = vmatpush.msrb.mxu2 %v2415_v30  ;;  %802 = vmatpush.msrb.mxu3 %v2405_v20 }
  0x4a   :  { %742 = vmatpush.msrb.mxu0 %v2435_v37  ;;  %762 = vmatpush.msrb.mxu1 %v2419_v31 }
  0x4b   :  { %782 = vmatpush.msrb.mxu2 %v2427_v34  ;;  %803 = vmatpush.msrb.mxu3 %v2411_v29 }
  0x4c   :  { %743 = vmatpush.msrb.mxu0 %v2441_v39  ;;  %763 = vmatpush.msrb.mxu1 %v2429_v35 }
  0x4d   :  { %783 = vmatpush.msrb.mxu2 %v2439_v38  ;;  %804 = vmatpush.msrb.mxu3 %v2421_v32 }
  0x4e   :  { %744 = vmatpush.msrb.mxu0 %v2459_v45  ;;  %764 = vmatpush.msrb.mxu1 %v2447_v41 }
  0x4f   :  { %784 = vmatpush.msrb.mxu2 %v2457_v44  ;;  %805 = vmatpush.msrb.mxu3 %v2431_v36 }
  0x50   :  { %745 = vmatpush.msrb.mxu0 %v2469_v48  ;;  %765 = vmatpush.msrb.mxu1 %v2455_v43 }
  0x51   :  { %785 = vmatpush.msrb.mxu2 %v2467_v47  ;;  %806 = vmatpush.msrb.mxu3 %v2449_v42 }
  0x52   :  { %746 = vmatpush.msrb.mxu0 %v2481_v52  ;;  %766 = vmatpush.msrb.mxu1 %v2472_v49 }
  0x53   :  { %786 = vmatpush.msrb.mxu2 %v2479_v51  ;;  %807 = vmatpush.msrb.mxu3 %v2463_v46 }
  0x54   :  { %747 = vmatpush.msrb.mxu0 %v2495_v56  ;;  %767 = vmatpush.msrb.mxu1 %v2490_v55 }
  0x55   :  { %787 = vmatpush.msrb.mxu2 %v2488_v54  ;;  %808 = vmatpush.msrb.mxu3 %v2474_v50 }
  0x56   :  { %748 = vmatpush.msrb.mxu0 %v2505_v59  ;;  %768 = vmatpush.msrb.mxu1 %v2501_v58 }
  0x57   :  { %788 = vmatpush.msrb.mxu2 %v2499_v57 }
  0x9d   :  { %v163_v1 = vpop.f32.mrf.mxu0  ;;  %v192_v2 = vpop.f32.mrf.mxu1 }
  0x9e   :  { %v164_v3 = vadd.f32 %v163_v1, %v2582_v63  ;;  %v193_v4 = vadd.f32 %v192_v2, %v2584_v0 }
  0xa0   :  { %v278_v7 = vrot.slane %v193_v4, 4 }
  0xa2   :  { %v250_v8 = vpop.f32.mrf.mxu3  ;;  %v221_v9 = vpop.f32.mrf.mxu2  ;;  %v287_v10 = vsel %vm286_vm1, %v164_v3, %v278_v7 }
  0xa3   :  { %v251_v11 = vadd.f32 %v250_v8, %v2588_v5  ;;  %v222_v12 = vadd.f32 %v221_v9, %v2590_v6  ;;  %382 = vst [vmem:[#allocation1] ss:$2 sm:$0xff] %v287_v10 }
  0xa5   :  { %v279_v14 = vrot.slane %v251_v11, 4  ;;  %v166_v15 = vpop.f32.mrf.mxu0  ;;  %v195_v16 = vpop.f32.mrf.mxu1 }
  0xa7   :  { %v2596_v17 = vsel %vm286_vm1, %v222_v12, %v279_v14  ;;  %v2599_v18 = vsel %vm286_vm1, %v279_v14, %v222_v12 }
  0xaa   :  { %v253_v19 = vpop.f32.mrf.mxu3  ;;  %v224_v21 = vpop.f32.mrf.mxu2 }
  0xab   :  { %v254_v22 = vadd.f32 %v253_v19, %v2588_v5  ;;  %v225_v23 = vadd.f32 %v224_v21, %v2590_v6 }
  0xad   :  { %v281_v24 = vrot.slane %v254_v22, 4  ;;  %v169_v26 = vpop.f32.mrf.mxu0  ;;  %v198_v27 = vpop.f32.mrf.mxu1 }
  0xae   :  { %v170_v28 = vadd.f32 %v169_v26, %v2582_v63  ;;  %v199_v40 = vadd.f32 %v198_v27, %v2584_v0  ;;  %v375_v26 = vlaneseq }
  0xaf   :  { %v2606_v53 = vsel %vm286_vm1, %v225_v23, %v281_v24  ;;  %v2609_v60 = vsel %vm286_vm1, %v281_v24, %v225_v23 }
  0xb0   :  { %v282_v61 = vrot.slane %v199_v40, 4 }
  0xb2   :  { %v256_v62 = vpop.f32.mrf.mxu3  ;;  %v227_v1 = vpop.f32.mrf.mxu2  ;;  %v2612_v2 = vsel %vm286_vm1, %v170_v28, %v282_v61  ;;  %v2615_v4 = vsel %vm286_vm1, %v282_v61, %v170_v28  ;;  %v2628_v61 = vshrl.u32 %v375_v26, 7 }
  0xb4   :  { %vm377_vm2 = vcmp.lt.s32.totalorder %v2628_v61, 4 }
  0xb5   :  { %v172_v8 = vpop.f32.mrf.mxu0 }
  0xb6   :  { %v201_v9 = vpop.f32.mrf.mxu1  ;;  %v173_v10 = vadd.f32 %v172_v8, %v2582_v63  ;;  %v2630_v8 = vld.sshfl [vmem:[#allocation1] sm:$0xff pattern:$0x75316420] }
  0xb7   :  { %v202_v11 = vadd.f32 %v201_v9, %v2584_v0  ;;  %v384_v9 = vld.sshfl [vmem:[#allocation1 + $0x8] sm:$0xff pattern:$0x75316420] }
  0xb9   :  { %v284_v12 = vrot.slane %v202_v11, 4  ;;  %v289_v11 = vsel %vm286_vm1, %v278_v7, %v164_v3 }
  0xba   :  { %v259_v14 = vpop.f32.mrf.mxu3 }
  0xbb   :  { %v230_v19 = vpop.f32.mrf.mxu2  ;;  %v2620_v21 = vsel %vm286_vm1, %v173_v10, %v284_v12  ;;  %v2623_v22 = vsel %vm286_vm1, %v284_v12, %v173_v10  ;;  %v260_v23 = vadd.f32 %v259_v14, %v2588_v5  ;;  %v290_v12 = vrot.slane %v289_v11, 4 }
  0xbc   :  { %v231_v24 = vadd.f32 %v230_v19, %v2590_v6 }
  0xbd   :  { %v285_v27 = vrot.slane %v260_v23, 4 }
  0xbe   :  { %v437_v50 = vpop.f32.mrf.mxu1 }
  0xbf   :  { %v309_v28 = vsel %vm286_vm1, %v285_v27, %v231_v24  ;;  %v306_v3 = vsel %vm286_vm1, %v231_v24, %v285_v27 }
  0xc0   :  { %v310_v40 = vrot.slane %v309_v28, 4 }
  0xc2   :  { %389 = vst [vmem:[#allocation1 + $0x1] ss:$2 sm:$0xff] %v310_v40  ;;  %v477_v10 = vpop.f32.mrf.mxu3  ;;  %v196_v40 = vadd.f32 %v195_v16, %v2584_v0  ;;  %v228_v0 = vadd.f32 %v227_v1, %v2590_v6 }
  0xc3   :  { %v481_v14 = vsel %vm377_vm2, %v437_v50, %v477_v10  ;;  %v257_v50 = vadd.f32 %v256_v62, %v2588_v5 }
  0xc4   :  { %v280_v10 = vrot.slane %v196_v40, 4 }
  0xc9   :  { %v390_v19 = vld.sshfl [vmem:[#allocation1] sm:$0xff pattern:$0x75316420]  ;;  %v391_v23 = vld.sshfl [vmem:[#allocation1 + $0x8] sm:$0xff pattern:$0x75316420] }
  0xca   :  { %550 = vst [vmem:[#allocation1] ss:$2 sm:$0xff] %v290_v12  ;;  %v395_v26 = vsel %vm286_vm1, %v384_v9, %v391_v23  ;;  %v167_v9 = vadd.f32 %v166_v15, %v2582_v63  ;;  %v283_v12 = vrot.slane %v257_v50, 4 }
  0xcb   :  { %v2637_v28 = vadd.f32 %v481_v14, %v395_v26 }
  0xcc   :  { %v293_v14 = vsel %vm286_vm1, %v167_v9, %v280_v10  ;;  %v303_v27 = vsel %vm286_vm1, %v283_v12, %v228_v0  ;;  %v295_v63 = vsel %vm286_vm1, %v280_v10, %v167_v9  ;;  %v300_v6 = vsel %vm286_vm1, %v228_v0, %v283_v12 }
  0xcd   :  { %2063 = vtanh.f32 %v2637_v28  ;;  %v304_v23 = vrot.slane %v303_v27, 4  ;;  %v296_v15 = vrot.slane %v295_v63, 4  ;;  %v298_v10 = vrot.slane %v2609_v60, 4 }
  0xce   :  { %v302_v12 = vrot.slane %v2615_v4, 4 }
  0xd1   :  { %v2642_v7 = vld.sshfl [vmem:[#allocation1] sm:$0xff pattern:$0x75316420]  ;;  %v2644_v57 = vld.sshfl [vmem:[#allocation1 + $0x8] sm:$0xff pattern:$0x75316420] }
  0xd2   :  { %557 = vst [vmem:[#allocation1 + $0x1] ss:$2 sm:$0xff] %v306_v3 }
  0xd3   :  { %v2064_v11 = vpop.eup %2063 }
  0xd4   :  { %525 = vrot.lane.b32.xlu0 %v2064_v11, %s2341_s14 }
  0xd9   :  { %v2651_v16 = vld.sshfl [vmem:[#allocation1] sm:$0xff pattern:$0x75316420]  ;;  %v2653_v24 = vld.sshfl [vmem:[#allocation1 + $0x8] sm:$0xff pattern:$0x75316420] }
  0xda   :  { %716 = vst [vmem:[#allocation1] ss:$2 sm:$0xff] %v293_v14 }
  0xe1   :  { %v2656_v26 = vld.sshfl [vmem:[#allocation1] sm:$0xff pattern:$0x75316420]  ;;  %v2658_v5 = vld.sshfl [vmem:[#allocation1 + $0x8] sm:$0xff pattern:$0x75316420] }
  0xe2   :  { %723 = vst [vmem:[#allocation1 + $0x1] ss:$2 sm:$0xff] %v304_v23 }
  0xe9   :  { %v2661_v62 = vld.sshfl [vmem:[#allocation1] sm:$0xff pattern:$0x75316420]  ;;  %v2663_v40 = vld.sshfl [vmem:[#allocation1 + $0x8] sm:$0xff pattern:$0x75316420] }
  0xea   :  { %882 = vst [vmem:[#allocation1] ss:$2 sm:$0xff] %v296_v15 }
  0xf1   :  { %v883_v1 = vld.sshfl [vmem:[#allocation1] sm:$0xff pattern:$0x75316420]  ;;  %v884_v3 = vld.sshfl [vmem:[#allocation1 + $0x8] sm:$0xff pattern:$0x75316420] }
  0xf2   :  { %889 = vst [vmem:[#allocation1 + $0x1] ss:$2 sm:$0xff] %v300_v6  ;;  %v417_v6 = vpop.f32.mrf.mxu0 }
  0xf9   :  { %v890_v11 = vld.sshfl [vmem:[#allocation1] sm:$0xff pattern:$0x75316420]  ;;  %v891_v50 = vld.sshfl [vmem:[#allocation1 + $0x8] sm:$0xff pattern:$0x75316420] }
  0xfa   :  { %1046 = vst [vmem:[#allocation1] ss:$2 sm:$0xff] %v2612_v2  ;;  %v2668_v14 = vsel %vm286_vm1, %v883_v1, %v890_v11  ;;  %v2671_v9 = vsel %vm286_vm1, %v884_v3, %v891_v50  ;;  %v457_v1 = vpop.f32.mrf.mxu2  ;;  %v394_v3 = vsel %vm286_vm1, %v2630_v8, %v390_v19  ;;  %v292_v8 = vrot.slane %v2599_v18, 4 }
  0xfb   :  { %v480_v60 = vsel %vm377_vm2, %v417_v6, %v457_v1  ;;  %v308_v1 = vrot.slane %v2623_v22, 4 }
  0xfc   :  { %v482_v4 = vadd.f32 %v480_v60, %v394_v3 }
 0x101   :  { %v1048_v27 = vld.sshfl [vmem:[#allocation1 + $0x8] sm:$0xff pattern:$0x75316420]  ;;  %v1047_v23 = vld.sshfl [vmem:[#allocation1] sm:$0xff pattern:$0x75316420] }
 0x102   :  { %1053 = vst [vmem:[#allocation1 + $0x1] ss:$2 sm:$0xff] %v298_v10  ;;  %v2003_v10 = vmul.f32 -1.442695, %v482_v4 }
 0x104   :  { %2065 = vpow2.f32 %v2003_v10 }
 0x109   :  { %v1054_v0 = vld.sshfl [vmem:[#allocation1] sm:$0xff pattern:$0x75316420]  ;;  %v1055_v63 = vld.sshfl [vmem:[#allocation1 + $0x8] sm:$0xff pattern:$0x75316420] }
 0x10a   :  { %v2676_v15 = vsel %vm286_vm1, %v1047_v23, %v1054_v0  ;;  %v2679_v2 = vsel %vm286_vm1, %v1048_v27, %v1055_v63  ;;  %1210 = vst [vmem:[#allocation1] ss:$2 sm:$0xff] %v302_v12  ;;  %v2066_v6 = vpop.eup %2065 }
 0x111   :  { %v1211_v11 = vld.sshfl [vmem:[#allocation1] sm:$0xff pattern:$0x75316420]  ;;  %v1212_v50 = vld.sshfl [vmem:[#allocation1 + $0x8] sm:$0xff pattern:$0x75316420] }
 0x112   :  { %1217 = vst [vmem:[#allocation1 + $0x1] ss:$2 sm:$0xff] %v2606_v53  ;;  %v490_v53 = vadd.f32 1.0, %v2066_v6 }
 0x114   :  { %2067 = vrcp.f32 %v490_v53  ;;  %vm497_vm4 = vweird.f32 %v490_v53 }
 0x119   :  { %v1218_v23 = vld.sshfl [vmem:[#allocation1] sm:$0xff pattern:$0x75316420]  ;;  %v1219_v0 = vld.sshfl [vmem:[#allocation1 + $0x8] sm:$0xff pattern:$0x75316420] }
 0x11a   :  { %v2687_v27 = vsel %vm286_vm1, %v1211_v11, %v1218_v23  ;;  %v2690_v12 = vsel %vm286_vm1, %v1212_v50, %v1219_v0  ;;  %1374 = vst [vmem:[#allocation1] ss:$2 sm:$0xff] %v2620_v21  ;;  %v2068_v21 = vpop.eup %2067 }
 0x11b   :  { %v493_v10 = vmul.f32 %v2068_v21, %v490_v53  ;;  %vm498_vm3 = vweird.f32 %v2068_v21 }
 0x11c   :  { %vm499_vm5 = vmor %vm497_vm4, %vm498_vm3 }
 0x11d   :  { %v494_v23 = vsub.f32 1.0, %v493_v10 }
 0x11f   :  { %v495_v22 = vmul.f32 %v2068_v21, %v494_v23 }
 0x121   :  { %v1375_v19 = vld.sshfl [vmem:[#allocation1] sm:$0xff pattern:$0x75316420]  ;;  %v1376_v63 = vld.sshfl [vmem:[#allocation1 + $0x8] sm:$0xff pattern:$0x75316420]  ;;  %v496_v0 = vadd.f32 %v2068_v21, %v495_v22 }
 0x122   :  { %1381 = vst [vmem:[#allocation1 + $0x1] ss:$2 sm:$0xff] %v292_v8  ;;  %v503_v8 = vand.u32 2147483648, %v490_v53 }
 0x123   :  { %v500_v6 = vsel %vm499_vm5, %v2068_v21, %v496_v0 }
 0x129   :  { %v1382_v3 = vld.sshfl [vmem:[#allocation1] sm:$0xff pattern:$0x75316420]  ;;  %v1383_v60 = vld.sshfl [vmem:[#allocation1 + $0x8] sm:$0xff pattern:$0x75316420] }
 0x12a   :  { %v2696_v11 = vsel %vm286_vm1, %v1375_v19, %v1382_v3  ;;  %v2699_v50 = vsel %vm286_vm1, %v1376_v63, %v1383_v60  ;;  %1538 = vst [vmem:[#allocation1] ss:$2 sm:$0xff] %v308_v1  ;;  %v501_v19 = vand.u32 2147483647, %v490_v53  ;;  %v504_v63 = vor.u32 1.1754944e-38, %v503_v8 }
 0x12b   :  { %v2004_v53 = vmul.f32 -1.442695, %v2637_v28 }
 0x12c   :  { %vm502_vm6 = vcmp.eq.f32.partialorder %v501_v19, 8.507059e+37 }
 0x12d   :  { %v505_v3 = vsel %vm502_vm6, %v504_v63, %v500_v6 }
 0x131   :  { %v2701_v4 = vld.sshfl [vmem:[#allocation1] sm:$0xff pattern:$0x75316420]  ;;  %v2703_v18 = vld.sshfl [vmem:[#allocation1 + $0x8] sm:$0xff pattern:$0x75316420] }
 0x132   :  { %3202 = vst [vmem:[#allocation21_spill] sm:$0xff] %v2701_v4  ;;  %v523_v4 = vmul.f32 0.0, %v505_v3 }
 0x133   :  { %3203 = vst [vmem:[#allocation22_spill] sm:$0xff] %v2703_v18 }
 0x134   :  { %1545 = vst [vmem:[#allocation1 + $0x1] ss:$2 sm:$0xff] %v2596_v17 }
 0x146   :  { %v526_v1 = vpop.permute.xlu0 %525 }
 0x147   :  { %v528_v60 = vmul.f32 %v526_v1, %v505_v3 }
 0x149   :  { %530 = vrot.lane.b32.xlu0 %v528_v60, %s2341_s14 }
 0x1bb   :  { %v531_v18 = vpop.permute.xlu0 %530 }
 0x1bc   :  { %v2707_v17 = vadd.f32 %v531_v18, %v523_v4 }
 0x1be   :  { %2069 = vtanh.f32 %v2707_v17 }
 0x1bf   :  { %2071 = vpow2.f32 %v2004_v53  ;;  %v3205_v53 = vld [vmem:[#allocation19_spill] sm:$0xff] }
 0x1c4   :  { %v2070_v10 = vpop.eup %2069 }
 0x1c5   :  { %536 = vrot.lane.b32.xlu1 %v2070_v10, %s2341_s14  ;;  %v2072_v21 = vpop.eup %2071  ;;  %v3204_v10 = vld [vmem:[#allocation20_spill] sm:$0xff] }
 0x1c6   :  { %v491_v23 = vadd.f32 1.0, %v2072_v21 }
 0x1c8   :  { %2073 = vrcp.f32 %v491_v23  ;;  %v518_v63 = vand.u32 2147483648, %v491_v23  ;;  %vm512_vm8 = vweird.f32 %v491_v23  ;;  %v516_v4 = vand.u32 2147483647, %v491_v23 }
 0x1ca   :  { %v519_v1 = vor.u32 1.1754944e-38, %v518_v63  ;;  %vm517_vm10 = vcmp.eq.f32.partialorder %v516_v4, 8.507059e+37 }
 0x1ce   :  { %v2074_v22 = vpop.eup %2073 }
 0x1cf   :  { %v508_v0 = vmul.f32 %v2074_v22, %v491_v23  ;;  %vm513_vm7 = vweird.f32 %v2074_v22 }
 0x1d0   :  { %vm514_vm9 = vmor %vm512_vm8, %vm513_vm7 }
 0x1d1   :  { %v509_v8 = vsub.f32 1.0, %v508_v0 }
 0x1d3   :  { %v510_v19 = vmul.f32 %v2074_v22, %v509_v8 }
 0x1d5   :  { %v511_v6 = vadd.f32 %v2074_v22, %v510_v19 }
 0x1d7   :  { %v515_v18 = vsel %vm514_vm9, %v2074_v22, %v511_v6  ;;  %v563_v22 = vsel %vm286_vm1, %v2644_v57, %v2653_v24 }
 0x1d8   :  { %v520_v3 = vsel %vm517_vm10, %v519_v1, %v515_v18  ;;  %v562_v18 = vsel %vm286_vm1, %v2642_v7, %v2651_v16 }
 0x237   :  { %v537_v28 = vpop.permute.xlu1 %536 }
 0x238   :  { %v539_v60 = vmul.f32 %v537_v28, %v520_v3 }
 0x23a   :  { %541 = vst.msk [vmem:[#allocation3] sm:$0xf] %vm540_vm11, %v539_v60  ;;  %2005 = vmatmul.msk.f32.vlgmr.msra.gmra.mxu0 %vm396_vm12, %v539_v60  ;;  %2006 = vmatmul.msk.f32.vlgmr.msra.gmra.mxu1 %vm396_vm12, %v539_v60 }
 0x23b   :  { %544 = vst.msk [vmem:[#allocation4 + $0x18] sm:$0xf0] %vm543_vm13, %v539_v60  ;;  %2007 = vmatmul.msk.f32.vlgmr.msra.gmra.mxu2 %vm396_vm12, %v539_v60  ;;  %2008 = vmatmul.msk.f32.vlgmr.msra.gmra.mxu3 %vm396_vm12, %v539_v60 }
 0x23c   :  { %907 = vmatpush.msra.mxu0 %v2423_v33  ;;  %927 = vmatpush.msra.mxu1 %v2408_v25 }
 0x23d   :  { %947 = vmatpush.msra.mxu2 %v2415_v30  ;;  %967 = vmatpush.msra.mxu3 %v2403_v13 }
 0x23e   :  { %908 = vmatpush.msra.mxu0 %v2435_v37  ;;  %928 = vmatpush.msra.mxu1 %v2419_v31 }
 0x23f   :  { %948 = vmatpush.msra.mxu2 %v2427_v34  ;;  %968 = vmatpush.msra.mxu3 %v2405_v20 }
 0x240   :  { %909 = vmatpush.msra.mxu0 %v2441_v39  ;;  %929 = vmatpush.msra.mxu1 %v2429_v35 }
 0x241   :  { %949 = vmatpush.msra.mxu2 %v2439_v38  ;;  %969 = vmatpush.msra.mxu3 %v2411_v29 }
 0x242   :  { %910 = vmatpush.msra.mxu0 %v2459_v45  ;;  %930 = vmatpush.msra.mxu1 %v2447_v41 }
 0x243   :  { %950 = vmatpush.msra.mxu2 %v2457_v44  ;;  %970 = vmatpush.msra.mxu3 %v2421_v32 }
 0x244   :  { %911 = vmatpush.msra.mxu0 %v2469_v48  ;;  %931 = vmatpush.msra.mxu1 %v2455_v43 }
 0x245   :  { %951 = vmatpush.msra.mxu2 %v2467_v47  ;;  %971 = vmatpush.msra.mxu3 %v2431_v36 }
 0x246   :  { %912 = vmatpush.msra.mxu0 %v2481_v52  ;;  %932 = vmatpush.msra.mxu1 %v2472_v49 }
 0x247   :  { %952 = vmatpush.msra.mxu2 %v2479_v51  ;;  %972 = vmatpush.msra.mxu3 %v2449_v42 }
 0x248   :  { %913 = vmatpush.msra.mxu0 %v2495_v56  ;;  %933 = vmatpush.msra.mxu1 %v2490_v55 }
 0x249   :  { %953 = vmatpush.msra.mxu2 %v2488_v54  ;;  %973 = vmatpush.msra.mxu3 %v2463_v46 }
 0x24a   :  { %914 = vmatpush.msra.mxu0 %v2505_v59  ;;  %934 = vmatpush.msra.mxu1 %v2501_v58 }
 0x24b   :  { %954 = vmatpush.msra.mxu2 %v3204_v10  ;;  %974 = vmatpush.msra.mxu3 %v3205_v53 }
 0x2b7   :  { %v604_v21 = vpop.f32.mrf.mxu1  ;;  %v584_v63 = vpop.f32.mrf.mxu0 }
 0x2be   :  { %v644_v23 = vpop.f32.mrf.mxu3  ;;  %v624_v6 = vpop.f32.mrf.mxu2 }
 0x2bf   :  { %v648_v0 = vsel %vm377_vm2, %v604_v21, %v644_v23  ;;  %v647_v4 = vsel %vm377_vm2, %v584_v63, %v624_v6 }
 0x2c0   :  { %v650_v8 = vadd.f32 %v648_v0, %v563_v22  ;;  %v649_v1 = vadd.f32 %v647_v4, %v562_v18 }
 0x2c2   :  { %2075 = vtanh.f32 %v650_v8  ;;  %v2009_v3 = vmul.f32 -1.442695, %v649_v1 }
 0x2c4   :  { %2077 = vpow2.f32 %v2009_v3 }
 0x2c8   :  { %v2076_v19 = vpop.eup %2075 }
 0x2c9   :  { %692 = vrot.lane.b32.xlu1 %v2076_v19, %s2341_s14 }
 0x2ca   :  { %v2078_v57 = vpop.eup %2077 }
 0x2cb   :  { %v657_v24 = vadd.f32 1.0, %v2078_v57 }
 0x2cd   :  { %2079 = vrcp.f32 %v657_v24  ;;  %v670_v0 = vand.u32 2147483648, %v657_v24  ;;  %vm664_vm15 = vweird.f32 %v657_v24  ;;  %v668_v19 = vand.u32 2147483647, %v657_v24 }
 0x2cf   :  { %v671_v63 = vor.u32 1.1754944e-38, %v670_v0  ;;  %vm669_vm3 = vcmp.eq.f32.partialorder %v668_v19, 8.507059e+37 }
 0x2d3   :  { %v2080_v28 = vpop.eup %2079 }
 0x2d4   :  { %v660_v60 = vmul.f32 %v2080_v28, %v657_v24  ;;  %vm665_vm14 = vweird.f32 %v2080_v28  ;;  %v2010_v24 = vmul.f32 -1.442695, %v650_v8 }
 0x2d5   :  { %vm666_vm0 = vmor %vm664_vm15, %vm665_vm14 }
 0x2d6   :  { %v661_v21 = vsub.f32 1.0, %v660_v60 }
 0x2d8   :  { %v662_v23 = vmul.f32 %v2080_v28, %v661_v21 }
 0x2da   :  { %v663_v22 = vadd.f32 %v2080_v28, %v662_v23 }
 0x2dc   :  { %v667_v6 = vsel %vm666_vm0, %v2080_v28, %v663_v22 }
 0x2dd   :  { %v672_v16 = vsel %vm669_vm3, %v671_v63, %v667_v6 }
 0x2de   :  { %v690_v18 = vmul.f32 %v672_v16, %v2707_v17 }
 0x33b   :  { %v693_v7 = vpop.permute.xlu1 %692 }
 0x33c   :  { %v695_v4 = vmul.f32 %v693_v7, %v672_v16 }
 0x33e   :  { %697 = vrot.lane.b32.xlu2 %v695_v4, %s2341_s14 }
 0x398   :  { %v698_v1 = vpop.permute.xlu2 %697 }
 0x399   :  { %v2763_v3 = vadd.f32 %v698_v1, %v690_v18 }
 0x39b   :  { %2081 = vtanh.f32 %v2763_v3 }
 0x39c   :  { %2083 = vpow2.f32 %v2010_v24 }
 0x3a1   :  { %v2082_v57 = vpop.eup %2081 }
 0x3a2   :  { %703 = vrot.lane.b32.xlu2 %v2082_v57, %s2341_s14  ;;  %v2084_v28 = vpop.eup %2083 }
 0x3a3   :  { %v658_v60 = vadd.f32 1.0, %v2084_v28 }
 0x3a5   :  { %2085 = vrcp.f32 %v658_v60  ;;  %v685_v17 = vand.u32 2147483648, %v658_v60  ;;  %vm679_vm5 = vweird.f32 %v658_v60  ;;  %v683_v6 = vand.u32 2147483647, %v658_v60 }
 0x3a7   :  { %v686_v7 = vor.u32 1.1754944e-38, %v685_v17  ;;  %vm684_vm7 = vcmp.eq.f32.partialorder %v683_v6, 8.507059e+37  ;;  %v2828_v6 = vld [vmem:[#allocation11 + $0xe0] sm:$0xff] }
 0x3ab   :  { %v2086_v21 = vpop.eup %2085 }
 0x3ac   :  { %v675_v23 = vmul.f32 %v2086_v21, %v658_v60  ;;  %vm680_vm4 = vweird.f32 %v2086_v21 }
 0x3ad   :  { %vm681_vm6 = vmor %vm679_vm5, %vm680_vm4 }
 0x3ae   :  { %v676_v22 = vsub.f32 1.0, %v675_v23 }
 0x3b0   :  { %v677_v0 = vmul.f32 %v2086_v21, %v676_v22 }
 0x3b2   :  { %v678_v19 = vadd.f32 %v2086_v21, %v677_v0 }
 0x3b4   :  { %v682_v63 = vsel %vm681_vm6, %v2086_v21, %v678_v19 }
 0x3b5   :  { %v687_v16 = vsel %vm684_vm7, %v686_v7, %v682_v63  ;;  %v2831_v63 = vld [vmem:[#allocation11 + $0xe8] sm:$0xff]  ;;  %v2834_v7 = vld [vmem:[#allocation11 + $0xf0] sm:$0xff] }
 0x3fc   :  { %v704_v4 = vpop.permute.xlu2 %703 }
 0x3fd   :  { %v706_v8 = vmul.f32 %v704_v4, %v687_v16  ;;  %v2837_v16 = vld [vmem:[#allocation11 + $0xf8] sm:$0xff]  ;;  %v2840_v4 = vld [vmem:[#allocation11 + $0xc0] sm:$0xff] }
 0x3ff   :  { %708 = vst.msk [vmem:[#allocation3 + $0x4] sm:$0xf] %vm540_vm11, %v706_v8  ;;  %2011 = vmatmul.msk.f32.vlgmr.msrb.gmra.mxu0 %vm396_vm12, %v706_v8  ;;  %2012 = vmatmul.msk.f32.vlgmr.msrb.gmra.mxu1 %vm396_vm12, %v706_v8 }
 0x400   :  { %710 = vst.msk [vmem:[#allocation4 + $0x14] sm:$0xf0] %vm543_vm13, %v706_v8  ;;  %2013 = vmatmul.msk.f32.vlgmr.msrb.gmra.mxu2 %vm396_vm12, %v706_v8  ;;  %2014 = vmatmul.msk.f32.vlgmr.msrb.gmra.mxu3 %vm396_vm12, %v706_v8  ;;  %v2843_v8 = vld [vmem:[#allocation11 + $0xc8] sm:$0xff] }
 0x401   :  { %1071 = vmatpush.msrb.mxu0 %v2423_v33  ;;  %1091 = vmatpush.msrb.mxu1 %v2408_v25  ;;  %v729_v25 = vsel %vm286_vm1, %v2658_v5, %v2663_v40 }
 0x402   :  { %1111 = vmatpush.msrb.mxu2 %v2415_v30  ;;  %1131 = vmatpush.msrb.mxu3 %v2403_v13 }
 0x403   :  { %1072 = vmatpush.msrb.mxu0 %v2435_v37  ;;  %1092 = vmatpush.msrb.mxu1 %v2419_v31 }
 0x404   :  { %1112 = vmatpush.msrb.mxu2 %v2427_v34  ;;  %1132 = vmatpush.msrb.mxu3 %v2405_v20 }
 0x405   :  { %1073 = vmatpush.msrb.mxu0 %v2441_v39  ;;  %1093 = vmatpush.msrb.mxu1 %v2429_v35  ;;  %v728_v35 = vsel %vm286_vm1, %v2656_v26, %v2661_v62 }
 0x406   :  { %1113 = vmatpush.msrb.mxu2 %v2439_v38  ;;  %1133 = vmatpush.msrb.mxu3 %v2411_v29 }
 0x407   :  { %1074 = vmatpush.msrb.mxu0 %v2459_v45  ;;  %1094 = vmatpush.msrb.mxu1 %v2447_v41 }
 0x408   :  { %1114 = vmatpush.msrb.mxu2 %v2457_v44  ;;  %1134 = vmatpush.msrb.mxu3 %v2421_v32 }
 0x409   :  { %1075 = vmatpush.msrb.mxu0 %v2469_v48  ;;  %1095 = vmatpush.msrb.mxu1 %v2455_v43 }
 0x40a   :  { %1115 = vmatpush.msrb.mxu2 %v2467_v47  ;;  %1135 = vmatpush.msrb.mxu3 %v2431_v36 }
 0x40b   :  { %1076 = vmatpush.msrb.mxu0 %v2481_v52  ;;  %1096 = vmatpush.msrb.mxu1 %v2472_v49 }
 0x40c   :  { %1116 = vmatpush.msrb.mxu2 %v2479_v51  ;;  %1136 = vmatpush.msrb.mxu3 %v2449_v42 }
 0x40d   :  { %1077 = vmatpush.msrb.mxu0 %v2495_v56  ;;  %1097 = vmatpush.msrb.mxu1 %v2490_v55 }
 0x40e   :  { %1117 = vmatpush.msrb.mxu2 %v2488_v54  ;;  %1137 = vmatpush.msrb.mxu3 %v2463_v46 }
 0x40f   :  { %1078 = vmatpush.msrb.mxu0 %v2505_v59  ;;  %1098 = vmatpush.msrb.mxu1 %v2501_v58 }
 0x410   :  { %1118 = vmatpush.msrb.mxu2 %v3204_v10  ;;  %1138 = vmatpush.msrb.mxu3 %v3205_v53 }
 0x47c   :  { %v770_v13 = vpop.f32.mrf.mxu1  ;;  %v750_v33 = vpop.f32.mrf.mxu0 }
 0x483   :  { %v810_v20 = vpop.f32.mrf.mxu3  ;;  %v790_v32 = vpop.f32.mrf.mxu2 }
 0x484   :  { %v814_v29 = vsel %vm377_vm2, %v770_v13, %v810_v20  ;;  %v813_v34 = vsel %vm377_vm2, %v750_v33, %v790_v32  ;;  %v2846_v13 = vld [vmem:[#allocation11 + $0xd0] sm:$0xff]  ;;  %v2849_v20 = vld [vmem:[#allocation11 + $0xd8] sm:$0xff]  ;;  %v2864_v32 = vld [vmem:[#allocation11 + $0x80] sm:$0xff] }
 0x485   :  { %v816_v30 = vadd.f32 %v814_v29, %v729_v25  ;;  %v815_v36 = vadd.f32 %v813_v34, %v728_v35  ;;  %v2852_v25 = vld [vmem:[#allocation11 + $0xa0] sm:$0xff]  ;;  %v2855_v29 = vld [vmem:[#allocation11 + $0xa8] sm:$0xff]  ;;  %v2870_v34 = vld [vmem:[#allocation11 + $0x90] sm:$0xff] }
 0x486   :  { %v2867_v33 = vld [vmem:[#allocation11 + $0x88] sm:$0xff]  ;;  %v2873_v35 = vld [vmem:[#allocation11 + $0x98] sm:$0xff] }
 0x487   :  { %2087 = vtanh.f32 %v816_v30  ;;  %v2015_v37 = vmul.f32 -1.442695, %v815_v36  ;;  %v2016_v40 = vmul.f32 -1.442695, %v816_v30  ;;  %v2858_v30 = vld [vmem:[#allocation11 + $0xb0] sm:$0xff]  ;;  %v2876_v36 = vld [vmem:[#allocation11 + $0x60] sm:$0xff] }
 0x489   :  { %2089 = vpow2.f32 %v2015_v37  ;;  %v2879_v37 = vld [vmem:[#allocation11 + $0x68] sm:$0xff] }
 0x48d   :  { %v2088_v31 = vpop.eup %2087 }
 0x48e   :  { %858 = vrot.lane.b32.xlu0 %v2088_v31, %s2341_s14  ;;  %v2861_v31 = vld [vmem:[#allocation11 + $0xb8] sm:$0xff] }
 0x48f   :  { %v2090_v38 = vpop.eup %2089 }
 0x490   :  { %v823_v39 = vadd.f32 1.0, %v2090_v38  ;;  %v2882_v38 = vld [vmem:[#allocation11 + $0x70] sm:$0xff] }
 0x492   :  { %2091 = vrcp.f32 %v823_v39  ;;  %v836_v46 = vand.u32 2147483648, %v823_v39  ;;  %vm830_vm9 = vweird.f32 %v823_v39  ;;  %v834_v47 = vand.u32 2147483647, %v823_v39 }
 0x494   :  { %v837_v49 = vor.u32 1.1754944e-38, %v836_v46  ;;  %vm835_vm14 = vcmp.eq.f32.partialorder %v834_v47, 8.507059e+37  ;;  %v2904_v46 = vld [vmem:[#allocation11 + $0x30] sm:$0xff]  ;;  %v2907_v47 = vld [vmem:[#allocation11 + $0x38] sm:$0xff] }
 0x498   :  { %v2092_v41 = vpop.eup %2091 }
 0x499   :  { %v826_v42 = vmul.f32 %v2092_v41, %v823_v39  ;;  %vm831_vm8 = vweird.f32 %v2092_v41  ;;  %v2885_v39 = vld [vmem:[#allocation11 + $0x78] sm:$0xff] }
 0x49a   :  { %vm832_vm10 = vmor %vm830_vm9, %vm831_vm8 }
 0x49b   :  { %v827_v43 = vsub.f32 1.0, %v826_v42  ;;  %v2891_v42 = vld [vmem:[#allocation11 + $0x48] sm:$0xff] }
 0x49d   :  { %v828_v44 = vmul.f32 %v2092_v41, %v827_v43  ;;  %v2894_v43 = vld [vmem:[#allocation11 + $0x50] sm:$0xff] }
 0x49f   :  { %v829_v45 = vadd.f32 %v2092_v41, %v828_v44  ;;  %v2897_v44 = vld [vmem:[#allocation11 + $0x58] sm:$0xff] }
 0x4a1   :  { %v833_v48 = vsel %vm832_vm10, %v2092_v41, %v829_v45  ;;  %v2888_v41 = vld [vmem:[#allocation11 + $0x40] sm:$0xff]  ;;  %v2901_v45 = vld [vmem:[#allocation11 + $0x28] sm:$0xff] }
 0x4a2   :  { %v838_v52 = vsel %vm835_vm14, %v837_v49, %v833_v48  ;;  %v2913_v48 = vld [vmem:[#allocation11 + $0x18] sm:$0xff] }
 0x4a3   :  { %v856_v55 = vmul.f32 %v838_v52, %v2763_v3 }
 0x500   :  { %v859_v51 = vpop.permute.xlu0 %858 }
 0x501   :  { %v861_v54 = vmul.f32 %v859_v51, %v838_v52 }
 0x503   :  { %863 = vrot.lane.b32.xlu1 %v861_v54, %s2341_s14 }
 0x575   :  { %v864_v26 = vpop.permute.xlu1 %863 }
 0x576   :  { %v2818_v5 = vadd.f32 %v864_v26, %v856_v55 }
 0x578   :  { %2093 = vtanh.f32 %v2818_v5 }
 0x579   :  { %2095 = vpow2.f32 %v2016_v40 }
 0x57e   :  { %v2094_v62 = vpop.eup %2093 }
 0x57f   :  { %869 = vrot.lane.b32.xlu2 %v2094_v62, %s2341_s14  ;;  %v2096_v53 = vpop.eup %2095 }
 0x580   :  { %v824_v18 = vadd.f32 1.0, %v2096_v53 }
 0x582   :  { %2097 = vrcp.f32 %v824_v18  ;;  %v851_v3 = vand.u32 2147483648, %v824_v18  ;;  %vm845_vm0 = vweird.f32 %v824_v18  ;;  %v849_v21 = vand.u32 2147483647, %v824_v18 }
 0x584   :  { %v852_v22 = vor.u32 1.1754944e-38, %v851_v3  ;;  %vm850_vm4 = vcmp.eq.f32.partialorder %v849_v21, 8.507059e+37 }
 0x588   :  { %v2098_v1 = vpop.eup %2097 }
 0x589   :  { %v841_v57 = vmul.f32 %v2098_v1, %v824_v18  ;;  %vm846_vm15 = vweird.f32 %v2098_v1 }
 0x58a   :  { %vm847_vm3 = vmor %vm845_vm0, %vm846_vm15 }
 0x58b   :  { %v842_v24 = vsub.f32 1.0, %v841_v57 }
 0x58d   :  { %v843_v28 = vmul.f32 %v2098_v1, %v842_v24 }
 0x58f   :  { %v844_v60 = vadd.f32 %v2098_v1, %v843_v28 }
 0x591   :  { %v848_v23 = vsel %vm847_vm3, %v2098_v1, %v844_v60 }
 0x592   :  { %v853_v0 = vsel %vm850_vm4, %v852_v22, %v848_v23 }
 0x5d9   :  { %v870_v19 = vpop.permute.xlu2 %869 }
 0x5da   :  { %v872_v17 = vmul.f32 %v870_v19, %v853_v0 }
 0x5dc   :  { %874 = vst.msk [vmem:[#allocation3 + $0x8] sm:$0xf] %vm540_vm11, %v872_v17  ;;  %2017 = vmatmul.msk.f32.vlgmr.msra.gmra.mxu0 %vm396_vm12, %v872_v17  ;;  %2018 = vmatmul.msk.f32.vlgmr.msra.gmra.mxu1 %vm396_vm12, %v872_v17 }
 0x5dd   :  { %876 = vst.msk [vmem:[#allocation4 + $0x10] sm:$0xf0] %vm543_vm13, %v872_v17  ;;  %2019 = vmatmul.msk.f32.vlgmr.msra.gmra.mxu2 %vm396_vm12, %v872_v17  ;;  %2020 = vmatmul.msk.f32.vlgmr.msra.gmra.mxu3 %vm396_vm12, %v872_v17 }
 0x5de   :  { %1235 = vmatpush.msra.mxu0 %v2828_v6  ;;  %1255 = vmatpush.msra.mxu1 %v2831_v63 }
 0x5df   :  { %1275 = vmatpush.msra.mxu2 %v2834_v7  ;;  %1295 = vmatpush.msra.mxu3 %v2837_v16 }
 0x5e0   :  { %1236 = vmatpush.msra.mxu0 %v2840_v4  ;;  %1256 = vmatpush.msra.mxu1 %v2843_v8 }
 0x5e1   :  { %1276 = vmatpush.msra.mxu2 %v2846_v13  ;;  %1296 = vmatpush.msra.mxu3 %v2849_v20 }
 0x5e2   :  { %1237 = vmatpush.msra.mxu0 %v2852_v25  ;;  %1257 = vmatpush.msra.mxu1 %v2855_v29 }
 0x5e3   :  { %1277 = vmatpush.msra.mxu2 %v2858_v30  ;;  %1297 = vmatpush.msra.mxu3 %v2861_v31 }
 0x5e4   :  { %1238 = vmatpush.msra.mxu0 %v2864_v32  ;;  %1258 = vmatpush.msra.mxu1 %v2867_v33 }
 0x5e5   :  { %1278 = vmatpush.msra.mxu2 %v2870_v34  ;;  %1298 = vmatpush.msra.mxu3 %v2873_v35 }
 0x5e6   :  { %1239 = vmatpush.msra.mxu0 %v2876_v36  ;;  %1259 = vmatpush.msra.mxu1 %v2879_v37 }
 0x5e7   :  { %1279 = vmatpush.msra.mxu2 %v2882_v38  ;;  %1299 = vmatpush.msra.mxu3 %v2885_v39 }
 0x5e8   :  { %1240 = vmatpush.msra.mxu0 %v2888_v41  ;;  %1260 = vmatpush.msra.mxu1 %v2891_v42 }
 0x5e9   :  { %1280 = vmatpush.msra.mxu2 %v2894_v43  ;;  %1300 = vmatpush.msra.mxu3 %v2897_v44 }
 0x5ea   :  { %1241 = vmatpush.msra.mxu0 %v2495_v56  ;;  %1261 = vmatpush.msra.mxu1 %v2901_v45 }
 0x5eb   :  { %1281 = vmatpush.msra.mxu2 %v2904_v46  ;;  %1301 = vmatpush.msra.mxu3 %v2907_v47 }
 0x5ec   :  { %1242 = vmatpush.msra.mxu0 %v2505_v59  ;;  %1262 = vmatpush.msra.mxu1 %v2501_v58 }
 0x5ed   :  { %1282 = vmatpush.msra.mxu2 %v3204_v10  ;;  %1302 = vmatpush.msra.mxu3 %v2913_v48 }
 0x659   :  { %v936_v56 = vpop.f32.mrf.mxu1  ;;  %v916_v55 = vpop.f32.mrf.mxu0 }
 0x660   :  { %v976_v49 = vpop.f32.mrf.mxu3  ;;  %v956_v59 = vpop.f32.mrf.mxu2 }
 0x661   :  { %v980_v51 = vsel %vm377_vm2, %v936_v56, %v976_v49  ;;  %v979_v58 = vsel %vm377_vm2, %v916_v55, %v956_v59 }
 0x662   :  { %v982_v52 = vadd.f32 %v980_v51, %v2671_v9  ;;  %v981_v10 = vadd.f32 %v979_v58, %v2668_v14 }
 0x664   :  { %2099 = vtanh.f32 %v982_v52  ;;  %v2021_v26 = vmul.f32 -1.442695, %v981_v10  ;;  %v2022_v56 = vmul.f32 -1.442695, %v982_v52 }
 0x666   :  { %2101 = vpow2.f32 %v2021_v26 }
 0x66a   :  { %v2100_v54 = vpop.eup %2099 }
 0x66b   :  { %1024 = vrot.lane.b32.xlu0 %v2100_v54, %s2341_s14 }
 0x66c   :  { %v2102_v62 = vpop.eup %2101 }
 0x66d   :  { %v989_v40 = vadd.f32 1.0, %v2102_v62 }
 0x66f   :  { %2103 = vrcp.f32 %v989_v40  ;;  %v1002_v24 = vand.u32 2147483648, %v989_v40  ;;  %vm996_vm6 = vweird.f32 %v989_v40  ;;  %v1000_v28 = vand.u32 2147483647, %v989_v40 }
 0x671   :  { %v1003_v3 = vor.u32 1.1754944e-38, %v1002_v24  ;;  %vm1001_vm8 = vcmp.eq.f32.partialorder %v1000_v28, 8.507059e+37  ;;  %v2971_v24 = vld [vmem:[#allocation11 + $0x10] sm:$0xff] }
 0x675   :  { %v2104_v53 = vpop.eup %2103 }
 0x676   :  { %v992_v18 = vmul.f32 %v2104_v53, %v989_v40  ;;  %vm997_vm5 = vweird.f32 %v2104_v53 }
 0x677   :  { %vm998_vm7 = vmor %vm996_vm6, %vm997_vm5 }
 0x678   :  { %v993_v1 = vsub.f32 1.0, %v992_v18 }
 0x67a   :  { %v994_v9 = vmul.f32 %v2104_v53, %v993_v1  ;;  %v2959_v1 = vld [vmem:[#allocation11 + $0x20] sm:$0xff] }
 0x67c   :  { %v995_v57 = vadd.f32 %v2104_v53, %v994_v9  ;;  %v2965_v9 = vld [vmem:[#allocation11] sm:$0xff] }
 0x67e   :  { %v999_v60 = vsel %vm998_vm7, %v2104_v53, %v995_v57  ;;  %v2968_v57 = vld [vmem:[#allocation11 + $0x8] sm:$0xff] }
 0x67f   :  { %v1004_v14 = vsel %vm1001_vm8, %v1003_v3, %v999_v60 }
 0x680   :  { %v1022_v22 = vmul.f32 %v1004_v14, %v2818_v5 }
 0x6dd   :  { %v1025_v21 = vpop.permute.xlu0 %1024 }
 0x6de   :  { %v1027_v23 = vmul.f32 %v1025_v21, %v1004_v14 }
 0x6e0   :  { %1029 = vrot.lane.b32.xlu1 %v1027_v23, %s2341_s14 }
 0x752   :  { %v1030_v0 = vpop.permute.xlu1 %1029 }
 0x753   :  { %v2925_v19 = vadd.f32 %v1030_v0, %v1022_v22 }
 0x755   :  { %2105 = vtanh.f32 %v2925_v19 }
 0x756   :  { %2107 = vpow2.f32 %v2022_v56 }
 0x75b   :  { %v2106_v17 = vpop.eup %2105 }
 0x75c   :  { %1035 = vrot.lane.b32.xlu2 %v2106_v17, %s2341_s14  ;;  %v2108_v49 = vpop.eup %2107 }
 0x75d   :  { %v990_v51 = vadd.f32 1.0, %v2108_v49 }
 0x75f   :  { %2109 = vrcp.f32 %v990_v51  ;;  %v1017_v5 = vand.u32 2147483648, %v990_v51  ;;  %vm1011_vm10 = vweird.f32 %v990_v51  ;;  %v1015_v26 = vand.u32 2147483647, %v990_v51 }
 0x761   :  { %v1018_v40 = vor.u32 1.1754944e-38, %v1017_v5  ;;  %vm1016_vm15 = vcmp.eq.f32.partialorder %v1015_v26, 8.507059e+37 }
 0x765   :  { %v2110_v54 = vpop.eup %2109 }
 0x766   :  { %v1007_v59 = vmul.f32 %v2110_v54, %v990_v51  ;;  %vm1012_vm9 = vweird.f32 %v2110_v54 }
 0x767   :  { %vm1013_vm14 = vmor %vm1011_vm10, %vm1012_vm9 }
 0x768   :  { %v1008_v55 = vsub.f32 1.0, %v1007_v59 }
 0x76a   :  { %v1009_v58 = vmul.f32 %v2110_v54, %v1008_v55 }
 0x76c   :  { %v1010_v10 = vadd.f32 %v2110_v54, %v1009_v58 }
 0x76e   :  { %v1014_v62 = vsel %vm1013_vm14, %v2110_v54, %v1010_v10 }
 0x76f   :  { %v1019_v53 = vsel %vm1016_vm15, %v1018_v40, %v1014_v62 }
 0x7b6   :  { %v1036_v18 = vpop.permute.xlu2 %1035 }
 0x7b7   :  { %v1038_v52 = vmul.f32 %v1036_v18, %v1019_v53 }
 0x7b9   :  { %1040 = vst.msk [vmem:[#allocation3 + $0xc] sm:$0xf] %vm540_vm11, %v1038_v52  ;;  %2023 = vmatmul.msk.f32.vlgmr.msrb.gmra.mxu0 %vm396_vm12, %v1038_v52  ;;  %2024 = vmatmul.msk.f32.vlgmr.msrb.gmra.mxu1 %vm396_vm12, %v1038_v52 }
 0x7ba   :  { %1042 = vst.msk [vmem:[#allocation4 + $0xc] sm:$0xf0] %vm543_vm13, %v1038_v52  ;;  %2025 = vmatmul.msk.f32.vlgmr.msrb.gmra.mxu2 %vm396_vm12, %v1038_v52  ;;  %2026 = vmatmul.msk.f32.vlgmr.msrb.gmra.mxu3 %vm396_vm12, %v1038_v52 }
 0x7bb   :  { %1399 = vmatpush.msrb.mxu0 %v2828_v6  ;;  %1419 = vmatpush.msrb.mxu1 %v2831_v63 }
 0x7bc   :  { %1439 = vmatpush.msrb.mxu2 %v2834_v7  ;;  %1459 = vmatpush.msrb.mxu3 %v2837_v16 }
 0x7bd   :  { %1400 = vmatpush.msrb.mxu0 %v2840_v4  ;;  %1420 = vmatpush.msrb.mxu1 %v2843_v8 }
 0x7be   :  { %1440 = vmatpush.msrb.mxu2 %v2846_v13  ;;  %1460 = vmatpush.msrb.mxu3 %v2849_v20 }
 0x7bf   :  { %1401 = vmatpush.msrb.mxu0 %v2852_v25  ;;  %1421 = vmatpush.msrb.mxu1 %v2855_v29 }
 0x7c0   :  { %1441 = vmatpush.msrb.mxu2 %v2858_v30  ;;  %1461 = vmatpush.msrb.mxu3 %v2861_v31 }
 0x7c1   :  { %1402 = vmatpush.msrb.mxu0 %v2864_v32  ;;  %1422 = vmatpush.msrb.mxu1 %v2867_v33 }
 0x7c2   :  { %1442 = vmatpush.msrb.mxu2 %v2870_v34  ;;  %1462 = vmatpush.msrb.mxu3 %v2873_v35 }
 0x7c3   :  { %1403 = vmatpush.msrb.mxu0 %v2876_v36  ;;  %1423 = vmatpush.msrb.mxu1 %v2879_v37 }
 0x7c4   :  { %1443 = vmatpush.msrb.mxu2 %v2882_v38  ;;  %1463 = vmatpush.msrb.mxu3 %v2885_v39 }
 0x7c5   :  { %1404 = vmatpush.msrb.mxu0 %v2888_v41  ;;  %1424 = vmatpush.msrb.mxu1 %v2891_v42 }
 0x7c6   :  { %1444 = vmatpush.msrb.mxu2 %v2894_v43  ;;  %1464 = vmatpush.msrb.mxu3 %v2897_v44 }
 0x7c7   :  { %1405 = vmatpush.msrb.mxu0 %v2959_v1  ;;  %1425 = vmatpush.msrb.mxu1 %v2901_v45 }
 0x7c8   :  { %1445 = vmatpush.msrb.mxu2 %v2904_v46  ;;  %1465 = vmatpush.msrb.mxu3 %v2907_v47 }
 0x7c9   :  { %1406 = vmatpush.msrb.mxu0 %v2965_v9  ;;  %1426 = vmatpush.msrb.mxu1 %v2968_v57 }
 0x7ca   :  { %1446 = vmatpush.msrb.mxu2 %v2971_v24  ;;  %1466 = vmatpush.msrb.mxu3 %v2913_v48 }
 0x836   :  { %v1100_v28 = vpop.f32.mrf.mxu1  ;;  %v1080_v22 = vpop.f32.mrf.mxu0 }
 0x83d   :  { %v1140_v60 = vpop.f32.mrf.mxu3  ;;  %v1120_v23 = vpop.f32.mrf.mxu2 }
 0x83e   :  { %v1144_v3 = vsel %vm377_vm2, %v1100_v28, %v1140_v60  ;;  %v1143_v0 = vsel %vm377_vm2, %v1080_v22, %v1120_v23 }
 0x83f   :  { %v1146_v21 = vadd.f32 %v1144_v3, %v2679_v2  ;;  %v1145_v17 = vadd.f32 %v1143_v0, %v2676_v15 }
 0x841   :  { %2111 = vtanh.f32 %v1146_v21  ;;  %v2027_v56 = vmul.f32 -1.442695, %v1145_v17  ;;  %v2028_v3 = vmul.f32 -1.442695, %v1146_v21 }
 0x843   :  { %2113 = vpow2.f32 %v2027_v56 }
 0x847   :  { %v2112_v14 = vpop.eup %2111 }
 0x848   :  { %1188 = vrot.lane.b32.xlu0 %v2112_v14, %s2341_s14 }
 0x849   :  { %v2114_v49 = vpop.eup %2113 }
 0x84a   :  { %v1153_v51 = vadd.f32 1.0, %v2114_v49 }
 0x84c   :  { %2115 = vrcp.f32 %v1153_v51  ;;  %v1166_v10 = vand.u32 2147483648, %v1153_v51  ;;  %vm1160_vm3 = vweird.f32 %v1153_v51  ;;  %v1164_v5 = vand.u32 2147483647, %v1153_v51 }
 0x84e   :  { %v1167_v62 = vor.u32 1.1754944e-38, %v1166_v10  ;;  %vm1165_vm5 = vcmp.eq.f32.partialorder %v1164_v5, 8.507059e+37 }
 0x852   :  { %v2116_v54 = vpop.eup %2115 }
 0x853   :  { %v1156_v59 = vmul.f32 %v2116_v54, %v1153_v51  ;;  %vm1161_vm0 = vweird.f32 %v2116_v54 }
 0x854   :  { %vm1162_vm4 = vmor %vm1160_vm3, %vm1161_vm0 }
 0x855   :  { %v1157_v55 = vsub.f32 1.0, %v1156_v59 }
 0x857   :  { %v1158_v2 = vmul.f32 %v2116_v54, %v1157_v55 }
 0x859   :  { %v1159_v58 = vadd.f32 %v2116_v54, %v1158_v2 }
 0x85b   :  { %v1163_v26 = vsel %vm1162_vm4, %v2116_v54, %v1159_v58 }
 0x85c   :  { %v1168_v15 = vsel %vm1165_vm5, %v1167_v62, %v1163_v26 }
 0x85d   :  { %v1186_v18 = vmul.f32 %v1168_v15, %v2925_v19 }
 0x8ba   :  { %v1189_v40 = vpop.permute.xlu0 %1188 }
 0x8bb   :  { %v1191_v53 = vmul.f32 %v1189_v40, %v1168_v15 }
 0x8bd   :  { %1193 = vrot.lane.b32.xlu1 %v1191_v53, %s2341_s14 }
 0x92f   :  { %v1194_v52 = vpop.permute.xlu1 %1193 }
 0x930   :  { %v2984_v28 = vadd.f32 %v1194_v52, %v1186_v18 }
 0x932   :  { %2117 = vtanh.f32 %v2984_v28 }
 0x933   :  { %2119 = vpow2.f32 %v2028_v3 }
 0x938   :  { %v2118_v60 = vpop.eup %2117 }
 0x939   :  { %1199 = vrot.lane.b32.xlu2 %v2118_v60, %s2341_s14  ;;  %v2120_v14 = vpop.eup %2119 }
 0x93a   :  { %v1154_v23 = vadd.f32 1.0, %v2120_v14 }
 0x93c   :  { %2121 = vrcp.f32 %v1154_v23  ;;  %v1181_v19 = vand.u32 2147483648, %v1154_v23  ;;  %vm1175_vm7 = vweird.f32 %v1154_v23  ;;  %v1179_v51 = vand.u32 2147483647, %v1154_v23 }
 0x93e   :  { %v1182_v59 = vor.u32 1.1754944e-38, %v1181_v19  ;;  %vm1180_vm9 = vcmp.eq.f32.partialorder %v1179_v51, 8.507059e+37 }
 0x942   :  { %v2122_v22 = vpop.eup %2121 }
 0x943   :  { %v1171_v0 = vmul.f32 %v2122_v22, %v1154_v23  ;;  %vm1176_vm6 = vweird.f32 %v2122_v22 }
 0x944   :  { %vm1177_vm8 = vmor %vm1175_vm7, %vm1176_vm6 }
 0x945   :  { %v1172_v17 = vsub.f32 1.0, %v1171_v0 }
 0x947   :  { %v1173_v56 = vmul.f32 %v2122_v22, %v1172_v17 }
 0x949   :  { %v1174_v49 = vadd.f32 %v2122_v22, %v1173_v56 }
 0x94b   :  { %v1178_v54 = vsel %vm1177_vm8, %v2122_v22, %v1174_v49 }
 0x94c   :  { %v1183_v55 = vsel %vm1180_vm9, %v1182_v59, %v1178_v54 }
 0x993   :  { %v1200_v2 = vpop.permute.xlu2 %1199 }
 0x994   :  { %v1202_v21 = vmul.f32 %v1200_v2, %v1183_v55 }
 0x996   :  { %1204 = vst.msk [vmem:[#allocation3 + $0x10] sm:$0xf] %vm540_vm11, %v1202_v21  ;;  %2029 = vmatmul.msk.f32.vlgmr.msra.gmra.mxu0 %vm396_vm12, %v1202_v21  ;;  %2030 = vmatmul.msk.f32.vlgmr.msra.gmra.mxu1 %vm396_vm12, %v1202_v21 }
 0x997   :  { %1206 = vst.msk [vmem:[#allocation4 + $0x8] sm:$0xf0] %vm543_vm13, %v1202_v21  ;;  %2031 = vmatmul.msk.f32.vlgmr.msra.gmra.mxu2 %vm396_vm12, %v1202_v21  ;;  %2032 = vmatmul.msk.f32.vlgmr.msra.gmra.mxu3 %vm396_vm12, %v1202_v21 }
 0x998   :  { %1563 = vmatpush.msra.mxu0 %v2828_v6  ;;  %1583 = vmatpush.msra.mxu1 %v2831_v63 }
 0x999   :  { %1603 = vmatpush.msra.mxu2 %v2834_v7  ;;  %1623 = vmatpush.msra.mxu3 %v2837_v16 }
 0x99a   :  { %1564 = vmatpush.msra.mxu0 %v2840_v4  ;;  %1584 = vmatpush.msra.mxu1 %v2843_v8 }
 0x99b   :  { %1604 = vmatpush.msra.mxu2 %v2846_v13  ;;  %1624 = vmatpush.msra.mxu3 %v2849_v20 }
 0x99c   :  { %1565 = vmatpush.msra.mxu0 %v2852_v25  ;;  %1585 = vmatpush.msra.mxu1 %v2855_v29 }
 0x99d   :  { %1605 = vmatpush.msra.mxu2 %v2858_v30  ;;  %1625 = vmatpush.msra.mxu3 %v2861_v31 }
 0x99e   :  { %1566 = vmatpush.msra.mxu0 %v2864_v32  ;;  %1586 = vmatpush.msra.mxu1 %v2867_v33 }
 0x99f   :  { %1606 = vmatpush.msra.mxu2 %v2870_v34  ;;  %1626 = vmatpush.msra.mxu3 %v2873_v35 }
 0x9a0   :  { %1567 = vmatpush.msra.mxu0 %v2876_v36  ;;  %1587 = vmatpush.msra.mxu1 %v2879_v37 }
 0x9a1   :  { %1607 = vmatpush.msra.mxu2 %v2882_v38  ;;  %1627 = vmatpush.msra.mxu3 %v2885_v39 }
 0x9a2   :  { %1568 = vmatpush.msra.mxu0 %v2888_v41  ;;  %1588 = vmatpush.msra.mxu1 %v2891_v42 }
 0x9a3   :  { %1608 = vmatpush.msra.mxu2 %v2894_v43  ;;  %1628 = vmatpush.msra.mxu3 %v2897_v44 }
 0x9a4   :  { %1569 = vmatpush.msra.mxu0 %v2959_v1  ;;  %1589 = vmatpush.msra.mxu1 %v2901_v45 }
 0x9a5   :  { %1609 = vmatpush.msra.mxu2 %v2904_v46  ;;  %1629 = vmatpush.msra.mxu3 %v2907_v47 }
 0x9a6   :  { %1570 = vmatpush.msra.mxu0 %v2965_v9  ;;  %1590 = vmatpush.msra.mxu1 %v2968_v57 }
 0x9a7   :  { %1610 = vmatpush.msra.mxu2 %v2971_v24  ;;  %1630 = vmatpush.msra.mxu3 %v2913_v48 }
 0xa13   :  { %v1264_v6 = vpop.f32.mrf.mxu1  ;;  %v1244_v13 = vpop.f32.mrf.mxu0 }
 0xa1a   :  { %v1304_v63 = vpop.f32.mrf.mxu3  ;;  %v1284_v8 = vpop.f32.mrf.mxu2 }
 0xa1b   :  { %v1308_v7 = vsel %vm377_vm2, %v1264_v6, %v1304_v63  ;;  %v1307_v20 = vsel %vm377_vm2, %v1244_v13, %v1284_v8 }
 0xa1c   :  { %v1310_v16 = vadd.f32 %v1308_v7, %v2690_v12  ;;  %v1309_v25 = vadd.f32 %v1307_v20, %v2687_v27 }
 0xa1e   :  { %2123 = vtanh.f32 %v1310_v16  ;;  %v2033_v29 = vmul.f32 -1.442695, %v1309_v25  ;;  %v2034_v47 = vmul.f32 -1.442695, %v1310_v16 }
 0xa20   :  { %2125 = vpow2.f32 %v2033_v29 }
 0xa24   :  { %v2124_v4 = vpop.eup %2123 }
 0xa25   :  { %1352 = vrot.lane.b32.xlu0 %v2124_v4, %s2341_s14 }
 0xa26   :  { %v2126_v30 = vpop.eup %2125 }
 0xa27   :  { %v1317_v31 = vadd.f32 1.0, %v2126_v30 }
 0xa29   :  { %2127 = vrcp.f32 %v1317_v31  ;;  %v1330_v36 = vand.u32 2147483648, %v1317_v31  ;;  %vm1324_vm14 = vweird.f32 %v1317_v31  ;;  %v1328_v37 = vand.u32 2147483647, %v1317_v31 }
 0xa2b   :  { %v1331_v39 = vor.u32 1.1754944e-38, %v1330_v36  ;;  %vm1329_vm0 = vcmp.eq.f32.partialorder %v1328_v37, 8.507059e+37 }
 0xa2f   :  { %v2128_v32 = vpop.eup %2127 }
 0xa30   :  { %v1320_v33 = vmul.f32 %v2128_v32, %v1317_v31  ;;  %vm1325_vm10 = vweird.f32 %v2128_v32 }
 0xa31   :  { %vm1326_vm15 = vmor %vm1324_vm14, %vm1325_vm10 }
 0xa32   :  { %v1321_v34 = vsub.f32 1.0, %v1320_v33 }
 0xa34   :  { %v1322_v12 = vmul.f32 %v2128_v32, %v1321_v34 }
 0xa36   :  { %v1323_v35 = vadd.f32 %v2128_v32, %v1322_v12 }
 0xa38   :  { %v1327_v38 = vsel %vm1326_vm15, %v2128_v32, %v1323_v35 }
 0xa39   :  { %v1332_v27 = vsel %vm1329_vm0, %v1331_v39, %v1327_v38 }
 0xa3a   :  { %v1350_v43 = vmul.f32 %v1332_v27, %v2984_v28 }
 0xa97   :  { %v1353_v41 = vpop.permute.xlu0 %1352 }
 0xa98   :  { %v1355_v42 = vmul.f32 %v1353_v41, %v1332_v27 }
 0xa9a   :  { %1357 = vrot.lane.b32.xlu1 %v1355_v42, %s2341_s14  ;;  %v1547_v42 = vld.sshfl [vmem:[#allocation1 + $0x8] sm:$0xff pattern:$0x75316420] }
 0xb0c   :  { %v1358_v44 = vpop.permute.xlu1 %1357 }
 0xb0d   :  { %v3035_v45 = vadd.f32 %v1358_v44, %v1350_v43 }
 0xb0f   :  { %2129 = vtanh.f32 %v3035_v45 }
 0xb10   :  { %2131 = vpow2.f32 %v2034_v47 }
 0xb15   :  { %v2130_v46 = vpop.eup %2129 }
 0xb16   :  { %1363 = vrot.lane.b32.xlu2 %v2130_v46, %s2341_s14  ;;  %v2132_v48 = vpop.eup %2131 }
 0xb17   :  { %v1318_v1 = vadd.f32 1.0, %v2132_v48 }
 0xb19   :  { %2133 = vrcp.f32 %v1318_v1  ;;  %v1345_v5 = vand.u32 2147483648, %v1318_v1  ;;  %vm1339_vm4 = vweird.f32 %v1318_v1  ;;  %v1343_v26 = vand.u32 2147483647, %v1318_v1 }
 0xb1b   :  { %v1346_v40 = vor.u32 1.1754944e-38, %v1345_v5  ;;  %vm1344_vm6 = vcmp.eq.f32.partialorder %v1343_v26, 8.507059e+37  ;;  %v3207_v5 = vld [vmem:[#allocation21_spill] sm:$0xff] }
 0xb1f   :  { %v2134_v9 = vpop.eup %2133 }
 0xb20   :  { %v1335_v57 = vmul.f32 %v2134_v9, %v1318_v1  ;;  %vm1340_vm3 = vweird.f32 %v2134_v9 }
 0xb21   :  { %vm1341_vm5 = vmor %vm1339_vm4, %vm1340_vm3 }
 0xb22   :  { %v1336_v24 = vsub.f32 1.0, %v1335_v57 }
 0xb24   :  { %v1337_v58 = vmul.f32 %v2134_v9, %v1336_v24 }
 0xb26   :  { %v1338_v10 = vadd.f32 %v2134_v9, %v1337_v58  ;;  %v1546_v58 = vld.sshfl [vmem:[#allocation1] sm:$0xff pattern:$0x75316420] }
 0xb27   :  { %v1550_v26 = vsel %vm286_vm1, %v3207_v5, %v1546_v58 }
 0xb28   :  { %v1342_v62 = vsel %vm1341_vm5, %v2134_v9, %v1338_v10  ;;  %v1709_v9 = vld [vmem:[#allocation4 + $0xc] sm:$0xf] }
 0xb29   :  { %v1347_v15 = vsel %vm1344_vm6, %v1346_v40, %v1342_v62 }
 0xb70   :  { %v1364_v53 = vpop.permute.xlu2 %1363 }
 0xb71   :  { %v1366_v18 = vmul.f32 %v1364_v53, %v1347_v15 }
 0xb73   :  { %1368 = vst.msk [vmem:[#allocation3 + $0x14] sm:$0xf] %vm540_vm11, %v1366_v18  ;;  %2035 = vmatmul.msk.f32.vlgmr.msrb.gmra.mxu0 %vm396_vm12, %v1366_v18  ;;  %2036 = vmatmul.msk.f32.vlgmr.msrb.gmra.mxu1 %vm396_vm12, %v1366_v18 }
 0xb74   :  { %1370 = vst.msk [vmem:[#allocation4 + $0x4] sm:$0xf0] %vm543_vm13, %v1366_v18  ;;  %2037 = vmatmul.msk.f32.vlgmr.msrb.gmra.mxu2 %vm396_vm12, %v1366_v18  ;;  %2038 = vmatmul.msk.f32.vlgmr.msrb.gmra.mxu3 %vm396_vm12, %v1366_v18 }
 0xbf0   :  { %v1428_v52 = vpop.f32.mrf.mxu1  ;;  %v1408_v22 = vpop.f32.mrf.mxu0 }
 0xbf7   :  { %v1468_v28 = vpop.f32.mrf.mxu3  ;;  %v1448_v23 = vpop.f32.mrf.mxu2 }
 0xbf8   :  { %v1472_v60 = vsel %vm377_vm2, %v1428_v52, %v1468_v28  ;;  %v1471_v0 = vsel %vm377_vm2, %v1408_v22, %v1448_v23 }
 0xbf9   :  { %v1474_v3 = vadd.f32 %v1472_v60, %v2699_v50  ;;  %v1473_v17 = vadd.f32 %v1471_v0, %v2696_v11 }
 0xbfb   :  { %2135 = vtanh.f32 %v1474_v3  ;;  %v2039_v56 = vmul.f32 -1.442695, %v1473_v17  ;;  %v2040_v25 = vmul.f32 -1.442695, %v1474_v3 }
 0xbfd   :  { %2137 = vpow2.f32 %v2039_v56 }
 0xc01   :  { %v2136_v14 = vpop.eup %2135 }
 0xc02   :  { %1516 = vrot.lane.b32.xlu0 %v2136_v14, %s2341_s14 }
 0xc03   :  { %v2138_v49 = vpop.eup %2137 }
 0xc04   :  { %v1481_v19 = vadd.f32 1.0, %v2138_v49 }
 0xc06   :  { %2139 = vrcp.f32 %v1481_v19  ;;  %v1494_v2 = vand.u32 2147483648, %v1481_v19  ;;  %vm1488_vm8 = vweird.f32 %v1481_v19  ;;  %v1492_v21 = vand.u32 2147483647, %v1481_v19 }
 0xc08   :  { %v1495_v63 = vor.u32 1.1754944e-38, %v1494_v2  ;;  %vm1493_vm10 = vcmp.eq.f32.partialorder %v1492_v21, 8.507059e+37 }
 0xc0c   :  { %v2140_v51 = vpop.eup %2139 }
 0xc0d   :  { %v1484_v54 = vmul.f32 %v2140_v51, %v1481_v19  ;;  %vm1489_vm7 = vweird.f32 %v2140_v51  ;;  %v1701_v19 = vld [vmem:[#allocation3 + $0xc] sm:$0xf] }
 0xc0e   :  { %vm1490_vm9 = vmor %vm1488_vm8, %vm1489_vm7 }
 0xc0f   :  { %v1485_v59 = vsub.f32 1.0, %v1484_v54 }
 0xc11   :  { %v1486_v50 = vmul.f32 %v2140_v51, %v1485_v59  ;;  %v1710_v59 = vld [vmem:[#allocation4 + $0x10] sm:$0xf] }
 0xc13   :  { %v1487_v55 = vadd.f32 %v2140_v51, %v1486_v50  ;;  %v1713_v50 = vld [vmem:[#allocation4 + $0x1c] sm:$0xf] }
 0xc15   :  { %v1491_v6 = vsel %vm1490_vm9, %v2140_v51, %v1487_v55 }
 0xc16   :  { %v1496_v11 = vsel %vm1493_vm10, %v1495_v63, %v1491_v6  ;;  %v1699_v63 = vld [vmem:[#allocation3 + $0x4] sm:$0xf] }
 0xc17   :  { %v1514_v4 = vmul.f32 %v1496_v11, %v3035_v45  ;;  %v3206_v45 = vld [vmem:[#allocation22_spill] sm:$0xff] }
 0xc18   :  { %v1551_v46 = vsel %vm286_vm1, %v3206_v45, %v1547_v42 }
 0xc74   :  { %v1517_v7 = vpop.permute.xlu0 %1516 }
 0xc75   :  { %v1519_v16 = vmul.f32 %v1517_v7, %v1496_v11 }
 0xc77   :  { %1521 = vrot.lane.b32.xlu1 %v1519_v16, %s2341_s14  ;;  %v1702_v16 = vld [vmem:[#allocation3 + $0x10] sm:$0xf] }
 0xce9   :  { %v1522_v8 = vpop.permute.xlu1 %1521 }
 0xcea   :  { %v3054_v13 = vadd.f32 %v1522_v8, %v1514_v4 }
 0xcec   :  { %2141 = vtanh.f32 %v3054_v13 }
 0xced   :  { %2143 = vpow2.f32 %v2040_v25 }
 0xcf2   :  { %v2142_v20 = vpop.eup %2141 }
 0xcf3   :  { %1527 = vrot.lane.b32.xlu2 %v2142_v20, %s2341_s14  ;;  %v2144_v29 = vpop.eup %2143  ;;  %v1708_v20 = vld [vmem:[#allocation4 + $0x8] sm:$0xf] }
 0xcf4   :  { %v1482_v30 = vadd.f32 1.0, %v2144_v29  ;;  %v3097_v29 = vld [vmem:[%s3192_s4] ss:$0 sm:$0xff]  ;;  %s2346_s4 = smov [#allocation13]  }
 0xcf5   :  { %s1966_s21 = sshll.u32 %s2346_s4, 4  ;;  %s1967_s21 = int_to_ptr.vmem [resolvable:$true] %s1966_s21 }
 0xcf6   :  { %2145 = vrcp.f32 %v1482_v30  ;;  %v1509_v35 = vand.u32 2147483648, %v1482_v30  ;;  %vm1503_vm15 = vweird.f32 %v1482_v30  ;;  %v1507_v36 = vand.u32 2147483647, %v1482_v30 }
 0xcf8   :  { %v1510_v38 = vor.u32 1.1754944e-38, %v1509_v35  ;;  %vm1508_vm3 = vcmp.eq.f32.partialorder %v1507_v36, 8.507059e+37 }
 0xcfc   :  { %v2146_v31 = vpop.eup %2145 }
 0xcfd   :  { %v1499_v32 = vmul.f32 %v2146_v31, %v1482_v30  ;;  %vm1504_vm14 = vweird.f32 %v2146_v31 }
 0xcfe   :  { %vm1505_vm0 = vmor %vm1503_vm15, %vm1504_vm14 }
 0xcff   :  { %v1500_v33 = vsub.f32 1.0, %v1499_v32 }
 0xd01   :  { %v1501_v34 = vmul.f32 %v2146_v31, %v1500_v33 }
 0xd03   :  { %v1502_v12 = vadd.f32 %v2146_v31, %v1501_v34 }
 0xd05   :  { %v1506_v37 = vsel %vm1505_vm0, %v2146_v31, %v1502_v12 }
 0xd06   :  { %v1511_v39 = vsel %vm1508_vm3, %v1510_v38, %v1506_v37 }
 0xd4d   :  { %v1528_v41 = vpop.permute.xlu2 %1527 }
 0xd4e   :  { %v1530_v27 = vmul.f32 %v1528_v41, %v1511_v39 }
 0xd50   :  { %1532 = vst.msk [vmem:[#allocation3 + $0x18] sm:$0xf] %vm540_vm11, %v1530_v27  ;;  %2041 = vmatmul.msk.f32.vlgmr.msra.gmra.mxu0 %vm396_vm12, %v1530_v27  ;;  %2042 = vmatmul.msk.f32.vlgmr.msra.gmra.mxu1 %vm396_vm12, %v1530_v27 }
 0xd51   :  { %1534 = vst.msk [vmem:[#allocation4] sm:$0xf0] %vm543_vm13, %v1530_v27  ;;  %2043 = vmatmul.msk.f32.vlgmr.msra.gmra.mxu2 %vm396_vm12, %v1530_v27  ;;  %2044 = vmatmul.msk.f32.vlgmr.msra.gmra.mxu3 %vm396_vm12, %v1530_v27 }
 0xd58   :  { %v1707_v54 = vld [vmem:[#allocation4 + $0x4] sm:$0xf] }
 0xdcd   :  { %v1592_v43 = vpop.f32.mrf.mxu1  ;;  %v1572_v24 = vpop.f32.mrf.mxu0 }
 0xdd4   :  { %v1632_v44 = vpop.f32.mrf.mxu3  ;;  %v1612_v57 = vpop.f32.mrf.mxu2 }
 0xdd5   :  { %v1636_v47 = vsel %vm377_vm2, %v1592_v43, %v1632_v44  ;;  %v1635_v10 = vsel %vm377_vm2, %v1572_v24, %v1612_v57 }
 0xdd6   :  { %v1638_v48 = vadd.f32 %v1636_v47, %v1551_v46  ;;  %v1637_v62 = vadd.f32 %v1635_v10, %v1550_v26  ;;  %v1703_v26 = vld [vmem:[#allocation3 + $0x14] sm:$0xf] }
 0xdd8   :  { %2147 = vtanh.f32 %v1638_v48  ;;  %v2045_v40 = vmul.f32 -1.442695, %v1637_v62  ;;  %v2046_v25 = vmul.f32 -1.442695, %v1638_v48  ;;  %v1700_v48 = vld [vmem:[#allocation3 + $0x8] sm:$0xf] }
 0xdda   :  { %2149 = vpow2.f32 %v2045_v40 }
 0xdde   :  { %v2148_v1 = vpop.eup %2147 }
 0xddf   :  { %1680 = vrot.lane.b32.xlu0 %v2148_v1, %s2341_s14 }
 0xde0   :  { %v2150_v15 = vpop.eup %2149 }
 0xde1   :  { %v1645_v53 = vadd.f32 1.0, %v2150_v15  ;;  %v1712_v15 = vld [vmem:[#allocation4 + $0x18] sm:$0xf] }
 0xde3   :  { %2151 = vrcp.f32 %v1645_v53  ;;  %v1658_v14 = vand.u32 2147483648, %v1645_v53  ;;  %vm1652_vm5 = vweird.f32 %v1645_v53  ;;  %v1656_v23 = vand.u32 2147483647, %v1645_v53 }
 0xde5   :  { %v1659_v22 = vor.u32 1.1754944e-38, %v1658_v14  ;;  %vm1657_vm2 = vcmp.eq.f32.partialorder %v1656_v23, 8.507059e+37 }
 0xde7   :  { %1728 = vrot.lane.b32.xlu0 %v1709_v9, %s2341_s14 }
 0xde9   :  { %v2152_v18 = vpop.eup %2151 }
 0xdea   :  { %v1648_v52 = vmul.f32 %v2152_v18, %v1645_v53  ;;  %vm1653_vm4 = vweird.f32 %v2152_v18 }
 0xdeb   :  { %vm1654_vm6 = vmor %vm1652_vm5, %vm1653_vm4 }
 0xdec   :  { %v1649_v28 = vsub.f32 1.0, %v1648_v52 }
 0xdee   :  { %v1650_v60 = vmul.f32 %v2152_v18, %v1649_v28 }
 0xdf0   :  { %v1651_v3 = vadd.f32 %v2152_v18, %v1650_v60 }
 0xdf2   :  { %v1655_v61 = vsel %vm1654_vm6, %v2152_v18, %v1651_v3  ;;  %v1698_v3 = vld [vmem:[#allocation3] sm:$0xf] }
 0xdf3   :  { %v1660_v17 = vsel %vm1657_vm2, %v1659_v22, %v1655_v61  ;;  %v1704_v22 = vld [vmem:[#allocation3 + $0x18] sm:$0xf] }
 0xdf4   :  { %v1678_v55 = vmul.f32 %v1660_v17, %v3054_v13  ;;  %v1711_v13 = vld [vmem:[#allocation4 + $0x14] sm:$0xf] }
 0xe51   :  { %v1681_v0 = vpop.permute.xlu0 %1680 }
 0xe52   :  { %v1683_v56 = vmul.f32 %v1681_v0, %v1660_v17 }
 0xe54   :  { %1685 = vrot.lane.b32.xlu1 %v1683_v56, %s2341_s14 }
 0xe59   :  { %v1729_v49 = vpop.permute.xlu0 %1728 }
 0xe5a   :  { %v3076_v51 = vsel %vm396_vm12, %v1701_v19, %v1729_v49 }
 0xe5b   :  { %1757 = vst [vmem:[#allocation13 + $0xc] sm:$0xf] %v3076_v51  ;;  %v1769_v30 = vmul.f32 %v3097_v29, %v3076_v51 }
 0xe5c   :  { %1724 = vrot.lane.b32.xlu1 %v1707_v54, %s2341_s14 }
 0xe5d   :  { %v1783_v32 = vsel %vm286_vm1, %v1769_v30, 0.0 }
 0xe64   :  { %1730 = vrot.lane.b32.xlu1 %v1710_v59, %s2341_s14 }
 0xe6c   :  { %1736 = vrot.lane.b32.xlu1 %v1713_v50, %s2341_s14 }
 0xec6   :  { %v1686_v2 = vpop.permute.xlu1 %1685 }
 0xec7   :  { %v1688_v21 = vadd.f32 %v1686_v2, %v1678_v55  ;;  %v2345_v2 = vmov 0  }
 0xec8   :  { %2060 = vset.pattern.permute.xlu2 %v2345_v2  ;;  %2059 = vset.pattern.permute.xlu1 %v2345_v2 }
 0xec9   :  { %2153 = vtanh.f32 %v1688_v21  ;;  %2058 = vset.pattern.permute.xlu0 %v2345_v2 }
 0xeca   :  { %2155 = vpow2.f32 %v2046_v25 }
 0xece   :  { %v1725_v6 = vpop.permute.xlu1 %1724 }
 0xecf   :  { %v2154_v7 = vpop.eup %2153  ;;  %v3084_v11 = vsel %vm396_vm12, %v1699_v63, %v1725_v6  ;;  %v2062_v63 = vld [vmem:[#allocation5] ss:$0 sm:$0xff] }
 0xed0   :  { %1755 = vst [vmem:[#allocation13 + $0x4] sm:$0xf] %v3084_v11  ;;  %1691 = vrot.lane.b32.xlu2 %v2154_v7, %s2341_s14  ;;  %v2156_v31 = vpop.eup %2155  ;;  %v1767_v53 = vmul.f32 %v3097_v29, %v3084_v11 }
 0xed1   :  { %v1646_v33 = vadd.f32 1.0, %v2156_v31 }
 0xed2   :  { %v1777_v18 = vsel %vm286_vm1, %v1767_v53, 0.0 }
 0xed3   :  { %2157 = vrcp.f32 %v1646_v33  ;;  %v1673_v41 = vand.u32 2147483648, %v1646_v33  ;;  %vm1667_vm8 = vweird.f32 %v1646_v33  ;;  %v1671_v27 = vand.u32 2147483647, %v1646_v33 }
 0xed5   :  { %v1674_v43 = vor.u32 1.1754944e-38, %v1673_v41  ;;  %vm1672_vm10 = vcmp.eq.f32.partialorder %v1671_v27, 8.507059e+37 }
 0xed6   :  { %v1731_v4 = vpop.permute.xlu1 %1730 }
 0xed7   :  { %v3089_v8 = vsel %vm396_vm12, %v1702_v16, %v1731_v4 }
 0xed8   :  { %1758 = vst [vmem:[#allocation13 + $0x10] sm:$0xf] %v3089_v8  ;;  %1726 = vrot.lane.b32.xlu2 %v1708_v20, %s2341_s14  ;;  %v1770_v34 = vmul.f32 %v3097_v29, %v3089_v8 }
 0xed9   :  { %v2158_v35 = vpop.eup %2157 }
 0xeda   :  { %v1786_v12 = vsel %vm286_vm1, %v1770_v34, 0.0  ;;  %v1663_v36 = vmul.f32 %v2158_v35, %v1646_v33  ;;  %vm1668_vm7 = vweird.f32 %v2158_v35 }
 0xedb   :  { %vm1669_vm9 = vmor %vm1667_vm8, %vm1668_vm7 }
 0xedc   :  { %v1664_v37 = vsub.f32 1.0, %v1663_v36 }
 0xede   :  { %v1665_v38 = vmul.f32 %v2158_v35, %v1664_v37  ;;  %v1737_v9 = vpop.permute.xlu1 %1736 }
 0xee0   :  { %1732 = vrot.lane.b32.xlu2 %v1711_v13, %s2341_s14  ;;  %v1666_v39 = vadd.f32 %v2158_v35, %v1665_v38 }
 0xee2   :  { %v1670_v42 = vsel %vm1669_vm9, %v2158_v35, %v1666_v39 }
 0xee3   :  { %v1675_v44 = vsel %vm1672_vm10, %v1674_v43, %v1670_v42 }
 0xf09   :  { %1784 = vadd.xlane.f32.xlu2 %v1783_v32 }
 0xf11   :  { %1787 = vadd.xlane.f32.xlu2 %v1786_v12 }
 0xf2a   :  { %v1692_v45 = vpop.permute.xlu2 %1691 }
 0xf2b   :  { %v1694_v46 = vmul.f32 %v1692_v45, %v1675_v44 }
 0xf2d   :  { %1696 = vst.msk [vmem:[#allocation3 + $0x1c] sm:$0xf] %vm540_vm11, %v1694_v46  ;;  %vm1810_vm11 = vcmask 3072  }
 0xf2e   :  { %1697 = vst.msk [vmem:[#allocation4 - $0x4] sm:$0xf0] %vm543_vm13, %v1694_v46 }
 0xf32   :  { %v1727_v47 = vpop.permute.xlu2 %1726 }
 0xf33   :  { %v3108_v1 = vsel %vm396_vm12, %v1700_v48, %v1727_v47 }
 0xf34   :  { %1756 = vst [vmem:[#allocation13 + $0x8] sm:$0xf] %v3108_v1  ;;  %v1768_v57 = vmul.f32 %v3097_v29, %v3108_v1  ;;  %v1705_v24 = vld [vmem:[#allocation3 + $0x1c] sm:$0xf] }
 0xf35   :  { %v1706_v58 = vld [vmem:[#allocation4] sm:$0xf]  ;;  %v3114_v10 = vsel %vm396_vm12, %v1705_v24, %v1737_v9 }
 0xf36   :  { %1722 = vrot.lane.b32.xlu0 %v1706_v58, %s2341_s14  ;;  %v1780_v5 = vsel %vm286_vm1, %v1768_v57, 0.0  ;;  %1761 = vst [vmem:[#allocation13 + $0x1c] sm:$0xf] %v3114_v10  ;;  %v1773_v17 = vmul.f32 %v3097_v29, %v3114_v10 }
 0xf37   :  { %1781 = vadd.xlane.f32.xlu1 %v1780_v5 }
 0xf38   :  { %v1795_v54 = vsel %vm286_vm1, %v1773_v17, 0.0 }
 0xf3a   :  { %v1733_v62 = vpop.permute.xlu2 %1732 }
 0xf3b   :  { %v3120_v40 = vsel %vm396_vm12, %v1703_v26, %v1733_v62 }
 0xf3c   :  { %1759 = vst [vmem:[#allocation13 + $0x14] sm:$0xf] %v3120_v40  ;;  %v1771_v52 = vmul.f32 %v3097_v29, %v3120_v40 }
 0xf3e   :  { %1734 = vrot.lane.b32.xlu0 %v1712_v15, %s2341_s14  ;;  %v1789_v28 = vsel %vm286_vm1, %v1771_v52, 0.0 }
 0xf68   :  { %1778 = vadd.xlane.f32.xlu0 %v1777_v18 }
 0xf70   :  { %1790 = vadd.xlane.f32.xlu0 %v1789_v28 }
 0xf7c   :  { %v1785_v59 = vpop.xlane.xlu2 %1784 }
 0xf7d   :  { %v1805_v13 = vadd.f32 %v2062_v63, %v1785_v59 }
 0xf7f   :  { %v1814_v36 = vsel %vm1810_vm11, %v1805_v13, -inf }
 0xf84   :  { %v1788_v50 = vpop.xlane.xlu2 %1787 }
 0xf85   :  { %v1806_v4 = vadd.f32 %v2062_v63, %v1788_v50 }
 0xf87   :  { %v1815_v33 = vsel %vm1810_vm11, %v1806_v4, -inf }
 0xfa8   :  { %v1723_v60 = vpop.permute.xlu0 %1722 }
 0xfa9   :  { %v3131_v14 = vsel %vm396_vm12, %v1698_v3, %v1723_v60 }
 0xfaa   :  { %1754 = vst [vmem:[#allocation13] sm:$0xf] %v3131_v14  ;;  %v1766_v23 = vmul.f32 %v3097_v29, %v3131_v14  ;;  %v1782_v21 = vpop.xlane.xlu1 %1781 }
 0xfab   :  { %v1804_v25 = vadd.f32 %v2062_v63, %v1782_v21 }
 0xfac   :  { %v1774_v61 = vsel %vm286_vm1, %v1766_v23, 0.0 }
 0xfad   :  { %1775 = vadd.xlane.f32.xlu2 %v1774_v61  ;;  %v1813_v38 = vsel %vm1810_vm11, %v1804_v25, -inf }
 0xfb0   :  { %v1735_v0 = vpop.permute.xlu0 %1734 }
 0xfb1   :  { %v3140_v56 = vsel %vm396_vm12, %v1704_v22, %v1735_v0 }
 0xfb2   :  { %1760 = vst [vmem:[#allocation13 + $0x18] sm:$0xf] %v3140_v56  ;;  %v1772_v49 = vmul.f32 %v3097_v29, %v3140_v56 }
 0xfb3   :  { %1974 = dma.vmem_to_hbm [thread:$0]  %s1967_s21, 512, %s1969_s24, [#allocation14], %s2341_s14, %s2341_s14, %s2342_s15  }
 0xfb4   :  { %v1792_v19 = vsel %vm286_vm1, %v1772_v49, 0.0 }
 0xfb5   :  { %1793 = vadd.xlane.f32.xlu1 %v1792_v19  ;;  %1796 = vadd.xlane.f32.xlu2 %v1795_v54 }
 0xfdb   :  { %v1779_v55 = vpop.xlane.xlu0 %1778 }
 0xfdc   :  { %v1803_v29 = vadd.f32 %v2062_v63, %v1779_v55 }
 0xfde   :  { %v1812_v39 = vsel %vm1810_vm11, %v1803_v29, -inf }
 0xfe3   :  { %v1791_v7 = vpop.xlane.xlu0 %1790 }
 0xfe4   :  { %v1807_v20 = vadd.f32 %v2062_v63, %v1791_v7 }
 0xfe6   :  { %v1817_v34 = vsel %vm1810_vm11, %v1807_v20, -inf }
 0xfe7   :  { %v1818_v42 = vmax.f32 %v1812_v39, %v1817_v34 }
0x1020   :  { %v1776_v6 = vpop.xlane.xlu2 %1775 }
0x1021   :  { %v1802_v16 = vadd.f32 %v2062_v63, %v1776_v6 }
0x1023   :  { %v1811_v30 = vsel %vm1810_vm11, %v1802_v16, -inf }
0x1024   :  { %v1816_v37 = vmax.f32 %v1811_v30, %v1815_v33 }
0x1026   :  { %v1823_v45 = vmax.f32 %v1816_v37, %v1818_v42 }
0x1028   :  { %v1794_v31 = vpop.xlane.xlu1 %1793  ;;  %v1797_v32 = vpop.xlane.xlu2 %1796 }
0x1029   :  { %v1808_v12 = vadd.f32 %v2062_v63, %v1794_v31  ;;  %v1809_v35 = vadd.f32 %v2062_v63, %v1797_v32 }
0x102b   :  { %v1819_v41 = vsel %vm1810_vm11, %v1808_v12, -inf  ;;  %v1821_v27 = vsel %vm1810_vm11, %v1809_v35, -inf }
0x102c   :  { %v1820_v43 = vmax.f32 %v1813_v38, %v1819_v41  ;;  %v1822_v44 = vmax.f32 %v1814_v36, %v1821_v27 }
0x102e   :  { %v1824_v46 = vmax.f32 %v1820_v43, %v1822_v44 }
0x1030   :  { %v1825_v47 = vmax.f32 %v1823_v45, %v1824_v46 }
0x1032   :  { %v1826_v48 = vsub.f32 %v1802_v16, %v1825_v47  ;;  %v1827_v9 = vsub.f32 %v1803_v29, %v1825_v47  ;;  %v1828_v57 = vsub.f32 %v1804_v25, %v1825_v47  ;;  %v1829_v24 = vsub.f32 %v1805_v13, %v1825_v47 }
0x1033   :  { %v1830_v58 = vsub.f32 %v1806_v4, %v1825_v47  ;;  %v1831_v15 = vsub.f32 %v1807_v20, %v1825_v47  ;;  %v1832_v18 = vsub.f32 %v1808_v12, %v1825_v47  ;;  %v1833_v28 = vsub.f32 %v1809_v35, %v1825_v47 }
0x1034   :  { %v1834_v5 = vmul.f32 1.442695, %v1826_v48  ;;  %v1836_v26 = vmul.f32 1.442695, %v1827_v9  ;;  %v1838_v62 = vmul.f32 1.442695, %v1828_v57 }
0x1035   :  { %v1840_v53 = vmul.f32 1.442695, %v1829_v24  ;;  %v1842_v52 = vmul.f32 1.442695, %v1830_v58  ;;  %v1844_v60 = vmul.f32 1.442695, %v1831_v15 }
0x1036   :  { %2159 = vpow2.f32 %v1834_v5  ;;  %v1846_v3 = vmul.f32 1.442695, %v1832_v18  ;;  %v1848_v22 = vmul.f32 1.442695, %v1833_v28 }
0x1037   :  { %2161 = vpow2.f32 %v1836_v26 }
0x1038   :  { %2163 = vpow2.f32 %v1838_v62 }
0x1039   :  { %2165 = vpow2.f32 %v1840_v53 }
0x103a   :  { %2167 = vpow2.f32 %v1842_v52 }
0x103b   :  { %2169 = vpow2.f32 %v1844_v60 }
0x103c   :  { %v2160_v23 = vpop.eup %2159  ;;  %2171 = vpow2.f32 %v1846_v3 }
0x103d   :  { %v2162_v61 = vpop.eup %2161  ;;  %v1850_v0 = vsel %vm1810_vm11, %v2160_v23, 0.0  ;;  %2173 = vpow2.f32 %v1848_v22 }
0x103e   :  { %v2164_v17 = vpop.eup %2163  ;;  %v1851_v49 = vsel %vm1810_vm11, %v2162_v61, 0.0 }
0x103f   :  { %v2166_v19 = vpop.eup %2165  ;;  %v1852_v54 = vadd.f32 %v1851_v49, %v1850_v0  ;;  %v1853_v59 = vsel %vm1810_vm11, %v2164_v17, 0.0 }
0x1040   :  { %v2168_v50 = vpop.eup %2167  ;;  %v1855_v2 = vsel %vm1810_vm11, %v2166_v19, 0.0 }
0x1041   :  { %v1854_v55 = vadd.f32 %v1853_v59, %v1852_v54  ;;  %v2170_v21 = vpop.eup %2169  ;;  %v1857_v63 = vsel %vm1810_vm11, %v2168_v50, 0.0 }
0x1042   :  { %v2172_v7 = vpop.eup %2171  ;;  %v1859_v4 = vsel %vm1810_vm11, %v2170_v21, 0.0 }
0x1043   :  { %v1856_v6 = vadd.f32 %v1855_v2, %v1854_v55  ;;  %v2174_v20 = vpop.eup %2173  ;;  %v1861_v25 = vsel %vm1810_vm11, %v2172_v7, 0.0 }
0x1044   :  { %v1863_v30 = vsel %vm1810_vm11, %v2174_v20, 0.0 }
0x1045   :  { %v1858_v16 = vadd.f32 %v1857_v63, %v1856_v6 }
0x1047   :  { %v1860_v13 = vadd.f32 %v1859_v4, %v1858_v16 }
0x1049   :  { %v1862_v29 = vadd.f32 %v1861_v25, %v1860_v13 }
0x104b   :  { %v1864_v31 = vadd.f32 %v1863_v30, %v1862_v29 }
0x104d   :  { %2175 = vrcp.f32 %v1864_v31  ;;  %v1876_v12 = vand.u32 2147483648, %v1864_v31  ;;  %v1874_v36 = vand.u32 2147483647, %v1864_v31  ;;  %vm1870_vm13 = vweird.f32 %v1864_v31 }
0x104f   :  { %v1877_v38 = vor.u32 1.1754944e-38, %v1876_v12  ;;  %vm1875_vm15 = vcmp.eq.f32.partialorder %v1874_v36, 8.507059e+37 }
0x1053   :  { %v2176_v32 = vpop.eup %2175 }
0x1054   :  { %v1866_v33 = vmul.f32 %v2176_v32, %v1864_v31  ;;  %vm1871_vm12 = vweird.f32 %v2176_v32 }
0x1055   :  { %vm1872_vm14 = vmor %vm1870_vm13, %vm1871_vm12 }
0x1056   :  { %v1867_v34 = vsub.f32 1.0, %v1866_v33 }
0x1058   :  { %v1868_v35 = vmul.f32 %v2176_v32, %v1867_v34 }
0x105a   :  { %v1869_v37 = vadd.f32 %v2176_v32, %v1868_v35 }
0x105c   :  { %v1873_v39 = vsel %vm1872_vm14, %v2176_v32, %v1869_v37 }
0x105d   :  { %v1878_v41 = vsel %vm1875_vm15, %v1877_v38, %v1873_v39 }
0x105e   :  { %v1881_v27 = vmul.f32 %v2164_v17, %v1878_v41  ;;  %v1880_v42 = vmul.f32 %v2162_v61, %v1878_v41  ;;  %v1879_v43 = vmul.f32 %v2160_v23, %v1878_v41  ;;  %v1883_v44 = vmul.f32 %v2168_v50, %v1878_v41 }
0x105f   :  { %v1882_v45 = vmul.f32 %v2166_v19, %v1878_v41  ;;  %v1886_v46 = vmul.f32 %v2174_v20, %v1878_v41  ;;  %v1885_v47 = vmul.f32 %v2172_v7, %v1878_v41  ;;  %v1884_v48 = vmul.f32 %v2170_v21, %v1878_v41 }
0x1060   :  { %1899 = vperm.xlu2 %2060, %v1881_v27   ;;  %1894 = vperm.xlu1 %2059, %v1880_v42  }
0x1061   :  { %1889 = vperm.xlu0 %2058, %v1879_v43  }
0x1068   :  { %1909 = vperm.xlu2 %2060, %v1883_v44   ;;  %1904 = vperm.xlu1 %2059, %v1882_v45  }
0x1069   :  { %1924 = vperm.xlu0 %2058, %v1886_v46  }
0x1070   :  { %1919 = vperm.xlu2 %2060, %v1885_v47   ;;  %1914 = vperm.xlu1 %2059, %v1884_v48  }
0x10ba   :  { %v1900_v9 = vpop.permute.xlu2 %1899 }
0x10bb   :  { %v1929_v53 = vmul.f32 %v1900_v9, %v3108_v1 }
0x10bd   :  { %v1938_v60 = vsel %vm286_vm1, %v1929_v53, 0.0 }
0x10c2   :  { %v1910_v26 = vpop.permute.xlu2 %1909 }
0x10ca   :  { %v1920_v61 = vpop.permute.xlu2 %1919 }
0x10cb   :  { %v1933_v49 = vmul.f32 %v1920_v61, %v3140_v56 }
0x10cd   :  { %v1946_v50 = vsel %vm286_vm1, %v1933_v49, 0.0 }
0x10d2   :  { %v1895_v57 = vpop.permute.xlu1 %1894 }
0x10d3   :  { %v1928_v24 = vmul.f32 %v1895_v57, %v3084_v11  ;;  %v1890_v58 = vpop.permute.xlu0 %1889  ;;  %v1931_v11 = vmul.f32 %v1910_v26, %v3089_v8 }
0x10d4   :  { %v1927_v5 = vmul.f32 %v1890_v58, %v3131_v14 }
0x10d5   :  { %v1936_v62 = vsel %vm286_vm1, %v1928_v24, 0.0  ;;  %v1942_v17 = vsel %vm286_vm1, %v1931_v11, 0.0 }
0x10d6   :  { %v1935_v15 = vsel %vm286_vm1, %v1927_v5, 0.0 }
0x10d7   :  { %v1937_v18 = vadd.f32 %v1936_v62, %v1935_v15 }
0x10d9   :  { %v1939_v23 = vadd.f32 %v1938_v60, %v1937_v18 }
0x10da   :  { %v1905_v52 = vpop.permute.xlu1 %1904 }
0x10db   :  { %v1930_v28 = vmul.f32 %v1905_v52, %v3076_v51  ;;  %v1925_v22 = vpop.permute.xlu0 %1924 }
0x10dc   :  { %v1934_v51 = vmul.f32 %v1925_v22, %v3114_v10 }
0x10dd   :  { %v1940_v3 = vsel %vm286_vm1, %v1930_v28, 0.0 }
0x10de   :  { %v1941_v14 = vadd.f32 %v1940_v3, %v1939_v23  ;;  %v1948_v55 = vsel %vm286_vm1, %v1934_v51, 0.0 }
0x10e0   :  { %v1943_v19 = vadd.f32 %v1942_v17, %v1941_v14 }
0x10e2   :  { %v1915_v0 = vpop.permute.xlu1 %1914 }
0x10e3   :  { %v1932_v1 = vmul.f32 %v1915_v0, %v3120_v40 }
0x10e5   :  { %v1944_v54 = vsel %vm286_vm1, %v1932_v1, 0.0 }
0x10e6   :  { %v1945_v59 = vadd.f32 %v1944_v54, %v1943_v19 }
0x10e8   :  { %v1947_v8 = vadd.f32 %v1946_v50, %v1945_v59 }
0x10ea   :  { %v1949_v56 = vadd.f32 %v1948_v55, %v1947_v8 }
0x10ec   :  { %1950 = vst [vmem:[#allocation12] sm:$0xf] %v1949_v56 }
0x10ed   :  { %1961 = dma.vmem_to_hbm [thread:$0]  %s1957_s25, 64, %s1959_s28, [#allocation8]  }
0x10ee   :  { %2333 = dma.done.wait [#allocation8], 64  }
0x10ef   :  { %2334 = vsyncadd [#allocation8], 4294967232 }
0x10f0   :  { %2335 = dma.done.wait [#allocation14], 512  }
0x10f1   :  { %2336 = vsyncadd [#allocation14], 4294966784 }
0x10f2   :  { %1983 = vsyncpa [#allocation7], 1 }
0x10f3   :  { %1984 = vsyncpa [#allocation10], 1 }
0x10f4   :  { %1985 = vsyncpa [#allocation8], 1 }
0x10f5   :  { %1986 = vsyncpa [#allocation14], 1 }

</bundles_post_ra>
